<compile_context>
chip_gen: v7x
topology: tpu7x:2x2x1
jax: 0.10.0
libtpu: 0.0.40
codegen_flags: <defaults>
</compile_context>

<pallas_src>
import math

import jax
import jax.numpy as jnp
from jax.experimental import pallas as pl
from jax.experimental.pallas import tpu as pltpu

_GN_GROUPS = 8
_GN_EPS = 1e-5
_IM2COL_MAX_CIN = 64            # above this, K = Cin already fills the MXU depth
_VMEM_LIMIT = 64 * 1024 * 1024  # raise the scoped default (16/32 MiB) explicitly


# ---------------------------------------------------------------------------
# In-kernel helpers (operate on traced values / refs)
# ---------------------------------------------------------------------------
def _conv3x3_flat(x, w_ref, mask_l, mask_r, H, W, Cin, Cout):
    """3x3 conv (padding 1) on a flattened (Cin, H*W) tile.

    x: (Cin, H*W) in the MXU dtype.  w_ref: (Cout, 9*Cin) ref, tap-major
    (dh*3 + dw), cin-minor columns.  mask_l / mask_r: (1, H*W) {0,1} masks
    zeroing the w==0 / w==W-1 columns (cross-row contamination of the lane
    shifts).  Returns the f32 accumulator (Cout, H*W), no bias.
    """
    HW = H * W
    P = W + 1                                            # covers the largest |shift|
    zpad = jnp.zeros((Cin, P), x.dtype)
    xpad = jnp.concatenate([zpad, x, zpad], axis=1)      # (Cin, HW + 2P)

    taps = []
    for dh in range(3):
        for dw in range(3):
            s = (dh - 1) * W + (dw - 1)
            t = xpad[:, P + s:P + s + HW]                # lane-shifted view
            if dw == 0:
                t = t * mask_l
            elif dw == 2:
                t = t * mask_r
            taps.append(t)

    if Cin <= _IM2COL_MAX_CIN:
        # One fat-K MXU matmul: (Cout, 9*Cin) @ (9*Cin, HW).
        patch = jnp.concatenate(taps, axis=0)            # sublane concat
        return jnp.dot(w_ref[...], patch, preferred_element_type=jnp.float32)

    # Large Cin: 9 accumulating matmuls, K = Cin each (no 9x im2col copy).
    acc = jnp.zeros((Cout, HW), jnp.float32)
    for t_idx, tap in enumerate(taps):
        wt = w_ref[:, t_idx * Cin:(t_idx + 1) * Cin]     # (Cout, Cin)
        acc = acc + jnp.dot(wt, tap, preferred_element_type=jnp.float32)
    return acc


def _group_norm(acc, gamma_ref, beta_ref, Cout, HW):
    """GroupNorm(8) on a (Cout, HW) f32 accumulator (per-sample statistics)."""
    cg = Cout // _GN_GROUPS
    inv_n = 1.0 / float(HW * cg)
    s = jnp.sum(acc, axis=1, keepdims=True)              # (Cout, 1)
    ss = jnp.sum(acc * acc, axis=1, keepdims=True)       # (Cout, 1)
    mean_parts, inv_parts = [], []
    for g in range(_GN_GROUPS):
        sl = slice(g * cg, (g + 1) * cg)
        mg = jnp.sum(s[sl], axis=0, keepdims=True) * inv_n            # (1, 1)
        vg = jnp.sum(ss[sl], axis=0, keepdims=True) * inv_n - mg * mg
        ig = jax.lax.rsqrt(jnp.maximum(vg, 0.0) + _GN_EPS)
        mean_parts.append(jnp.broadcast_to(mg, (cg, 1)))
        inv_parts.append(jnp.broadcast_to(ig, (cg, 1)))
    mean_c = jnp.concatenate(mean_parts, axis=0)         # (Cout, 1)
    inv_c = jnp.concatenate(inv_parts, axis=0)           # (Cout, 1)
    return (acc - mean_c) * (inv_c * gamma_ref[...]) + beta_ref[...]


# ---------------------------------------------------------------------------
# Kernel factories
# ---------------------------------------------------------------------------
def _make_conv_kernel(H, W, cin_list, Cout, do_gn, do_relu):
    n_x = len(cin_list)
    Cin = sum(cin_list)

    def kernel(*refs):
        x_refs = refs[:n_x]
        w_ref, b_ref = refs[n_x], refs[n_x + 1]
        i = n_x + 2
        if do_gn:
            gamma_ref, beta_ref = refs[i], refs[i + 1]
            i += 2
        mask_l, mask_r, o_ref = refs[i], refs[i + 1], refs[i + 2]

        if n_x == 1:
            x = x_refs[0][0]                             # (Cin, HW)
        else:
            # lay1: channel concat of (x, bbox_mask) fused into the kernel.
            x = jnp.concatenate([r[0] for r in x_refs], axis=0)
        acc = _conv3x3_flat(x, w_ref, mask_l[...], mask_r[...], H, W, Cin, Cout)
        acc = acc + b_ref[...]                           # conv bias before GN
        if do_gn:
            acc = _group_norm(acc, gamma_ref, beta_ref, Cout, H * W)
        if do_relu:
            acc = jnp.maximum(acc, 0.0)
        o_ref[0] = acc.astype(o_ref.dtype)               # lane-dense (Cout, HW)

    return kernel


def _make_fused_level_kernel(H, W, Cf, C, Cout):
    HW = H * W

    def kernel(fpn_ref, aw_ref, ab_ref, hup_ref, cw_ref, cb_ref,
               g_ref, bt_ref, mask_l, mask_r, o_ref):
        # 1x1 adapter on the raw FPN map: (C, Cf) @ (Cf, HW) on the MXU.
        a = jnp.dot(aw_ref[...], fpn_ref[0], preferred_element_type=jnp.float32)
        a = a + ab_ref[...]                              # (C, HW) f32
        fused = (a + hup_ref[0].astype(jnp.float32)).astype(cw_ref.dtype)
        acc = _conv3x3_flat(fused, cw_ref, mask_l[...], mask_r[...], H, W, C, Cout)
        acc = acc + cb_ref[...]
        acc = _group_norm(acc, g_ref, bt_ref, Cout, HW)
        acc = jnp.maximum(acc, 0.0)
        o_ref[0] = acc.astype(o_ref.dtype)

    return kernel


# ---------------------------------------------------------------------------
# Wrappers
# ---------------------------------------------------------------------------
def _edge_masks(H, W, dtype):
    wpos = jnp.arange(H * W, dtype=jnp.int32) % W
    mask_l = (wpos >= 1).astype(dtype).reshape(1, H * W)
    mask_r = (wpos <= W - 2).astype(dtype).reshape(1, H * W)
    return mask_l, mask_r


def _compiler_params():
    return pltpu.CompilerParams(dimension_semantics=("parallel",),
                                vmem_limit_bytes=_VMEM_LIMIT)


def conv3x3_gn_relu(xs, H, W, w, bias, gamma=None, beta=None, *,
                    do_gn, do_relu, out_dtype):
    """xs: list of (B, C_i, H*W) activations (channel-concatenated in-kernel).
    w: (9, Cin, Cout) tap-major conv weight."""
    B = xs[0].shape[0]
    HW = H * W
    cin_list = [int(v.shape[1]) for v in xs]
    Cin = sum(cin_list)
    Cout = int(w.shape[-1])
    act = xs[0].dtype

    kernel = _make_conv_kernel(H, W, cin_list, Cout, do_gn, do_relu)
    w2 = jnp.transpose(w, (2, 0, 1)).reshape(Cout, 9 * Cin).astype(act)
    mask_l, mask_r = _edge_masks(H, W, act)

    args = list(xs) + [w2, bias.reshape(Cout, 1).astype(jnp.float32)]
    in_specs = [pl.BlockSpec((1, c, HW), lambda n: (n, 0, 0)) for c in cin_list]
    in_specs += [pl.BlockSpec((Cout, 9 * Cin), lambda n: (0, 0)),
                 pl.BlockSpec((Cout, 1), lambda n: (0, 0))]
    if do_gn:
        args += [gamma.reshape(Cout, 1).astype(jnp.float32),
                 beta.reshape(Cout, 1).astype(jnp.float32)]
        in_specs += [pl.BlockSpec((Cout, 1), lambda n: (0, 0))] * 2
    args += [mask_l, mask_r]
    in_specs += [pl.BlockSpec((1, HW), lambda n: (0, 0))] * 2

    return pl.pallas_call(
        kernel,
        out_shape=jax.ShapeDtypeStruct((B, Cout, HW), out_dtype),
        grid=(B,),
        in_specs=in_specs,
        out_specs=pl.BlockSpec((1, Cout, HW), lambda n: (n, 0, 0)),
        compiler_params=_compiler_params(),
    )(*args)


def fused_fpn_level(h_up, fpn, aw, ab, cw, cb, gamma, beta, *, H, W, out_dtype):
    """One FPN level: adapter1x1(fpn) + upsampled(h) -> conv3x3 -> GN -> ReLU.

    h_up: (B, C, H*W) pre-upsampled activation.  fpn: (Bf, Cf, H*W) with
    Bf | B; the PyTorch `_expand` repeat is folded into the index_map."""
    B, C, HW = h_up.shape
    Bf, Cf, _ = fpn.shape
    assert B % Bf == 0 and HW == H * W
    rep = B // Bf
    Cout = int(cw.shape[-1])
    act = h_up.dtype

    kernel = _make_fused_level_kernel(H, W, Cf, C, Cout)
    mask_l, mask_r = _edge_masks(H, W, act)

    return pl.pallas_call(
        kernel,
        out_shape=jax.ShapeDtypeStruct((B, Cout, HW), out_dtype),
        grid=(B,),
        in_specs=[
            pl.BlockSpec((1, Cf, HW), lambda n: (n // rep, 0, 0)),  # _expand via index_map
            pl.BlockSpec((C, Cf), lambda n: (0, 0)),
            pl.BlockSpec((C, 1), lambda n: (0, 0)),
            pl.BlockSpec((1, C, HW), lambda n: (n, 0, 0)),
            pl.BlockSpec((Cout, 9 * C), lambda n: (0, 0)),
            pl.BlockSpec((Cout, 1), lambda n: (0, 0)),
            pl.BlockSpec((Cout, 1), lambda n: (0, 0)),
            pl.BlockSpec((Cout, 1), lambda n: (0, 0)),
            pl.BlockSpec((1, HW), lambda n: (0, 0)),
            pl.BlockSpec((1, HW), lambda n: (0, 0)),
        ],
        out_specs=pl.BlockSpec((1, Cout, HW), lambda n: (n, 0, 0)),
        compiler_params=_compiler_params(),
    )(fpn.astype(act),
      jnp.transpose(aw, (1, 0)).astype(act),               # (Cf, C) -> (C, Cf)
      ab.reshape(C, 1).astype(jnp.float32),
      h_up,
      jnp.transpose(cw, (2, 0, 1)).reshape(Cout, 9 * C).astype(act),
      cb.reshape(Cout, 1).astype(jnp.float32),
      gamma.reshape(Cout, 1).astype(jnp.float32),
      beta.reshape(Cout, 1).astype(jnp.float32),
      mask_l, mask_r)


# ---------------------------------------------------------------------------
# XLA glue: nearest-neighbour upsample on the flattened activation
# ---------------------------------------------------------------------------
def _nearest_upsample_flat(h, Hs, Ws, Hf, Wf):
    """(B, C, Hs*Ws) -> (B, C, Hf*Wf), matches F.interpolate(mode='nearest')."""
    B, C, _ = h.shape
    h4 = h.reshape(B, C, Hs, Ws)
    if Hf % Hs == 0 and Wf % Ws == 0:
        rH, rW = Hf // Hs, Wf // Ws
        up = jnp.broadcast_to(h4[:, :, :, None, :, None], (B, C, Hs, rH, Ws, rW))
        return up.reshape(B, C, Hf * Wf)
    rows = (jnp.arange(Hf) * Hs) // Hf
    cols = (jnp.arange(Wf) * Ws) // Wf
    return h4[:, :, rows][:, :, :, cols].reshape(B, C, Hf * Wf)


# ---------------------------------------------------------------------------
# Parameters (deterministic synthetic init, mirrors the PyTorch __init__)
# ---------------------------------------------------------------------------
def _kaiming_uniform(key, shape, fan_in):
    bound = math.sqrt(3.0 / fan_in)         # kaiming_uniform_(a=1): gain = 1
    return jax.random.uniform(key, shape, jnp.float32, -bound, bound)


def init_params(key, dim, fpn_dims, context_dim):
    inter = [dim, context_dim // 2, context_dim // 4, context_dim // 8,
             context_dim // 16, context_dim // 64]
    conv3_specs = [("lay1", dim, dim), ("lay2", dim, inter[1]),
                   ("lay3", inter[1], inter[2]), ("lay4", inter[2], inter[3]),
                   ("lay5", inter[3], inter[4]), ("out_lay", inter[4], 15)]
    conv1_specs = [("adapter1", fpn_dims[0], inter[1]),
                   ("adapter2", fpn_dims[1], inter[2]),
                   ("adapter3", fpn_dims[2], inter[3])]
    params = {}
    keys = jax.random.split(key, len(conv3_specs) + len(conv1_specs))
    ki = 0
    for name, cin, cout in conv3_specs:
        params[name + "_w"] = _kaiming_uniform(keys[ki], (9, cin, cout), cin * 9)
        params[name + "_b"] = jnp.zeros((cout,), jnp.float32)
        ki += 1
    for name, cin, cout in conv1_specs:
        params[name + "_w"] = _kaiming_uniform(keys[ki], (cin, cout), cin)
        params[name + "_b"] = jnp.zeros((cout,), jnp.float32)
        ki += 1
    for gn, c in zip(["gn1", "gn2", "gn3", "gn4", "gn5"],
                     [dim, inter[1], inter[2], inter[3], inter[4]]):
        params[gn + "_g"] = jnp.ones((c,), jnp.float32)
        params[gn + "_b"] = jnp.zeros((c,), jnp.float32)
    return params


# ---------------------------------------------------------------------------
# Forward pass (PyTorch-facing NCHW API; NCHW is already the kernel layout)
# ---------------------------------------------------------------------------
def detr_mask_head_small_conv2(x, bbox_mask, fpns, params, *, act_dtype=jnp.bfloat16):
    """x: (B, Cx, H, W); bbox_mask: (B, Q, nheads, H, W); fpns: 3 NCHW tensors
    whose batch may divide B (the PyTorch `_expand` path).  Returns
    (B, 15, H_fpn3, W_fpn3) float32.  Inter-layer activations are bf16; all
    matmul accumulation and GroupNorm math is f32 inside the kernels."""
    B, Cx, H, W = x.shape
    Qh = bbox_mask.shape[1] * bbox_mask.shape[2]
    x_flat = x.reshape(B, Cx, H * W).astype(act_dtype)         # free reshapes,
    bm_flat = bbox_mask.reshape(B, Qh, H * W).astype(act_dtype)  # no transposes

    h = conv3x3_gn_relu([x_flat, bm_flat], H, W,
                        params["lay1_w"], params["lay1_b"],
                        params["gn1_g"], params["gn1_b"],
                        do_gn=True, do_relu=True, out_dtype=act_dtype)
    h = conv3x3_gn_relu([h], H, W,
                        params["lay2_w"], params["lay2_b"],
                        params["gn2_g"], params["gn2_b"],
                        do_gn=True, do_relu=True, out_dtype=act_dtype)

    cur_h, cur_w = H, W
    for i, (ad, lay, gn) in enumerate([("adapter1", "lay3", "gn3"),
                                       ("adapter2", "lay4", "gn4"),
                                       ("adapter3", "lay5", "gn5")]):
        Bf, Cf, Hf, Wf = fpns[i].shape
        f_flat = fpns[i].reshape(Bf, Cf, Hf * Wf).astype(act_dtype)
        h_up = _nearest_upsample_flat(h, cur_h, cur_w, Hf, Wf)
        h = fused_fpn_level(h_up, f_flat,
                            params[ad + "_w"], params[ad + "_b"],
                            params[lay + "_w"], params[lay + "_b"],
                            params[gn + "_g"], params[gn + "_b"],
                            H=Hf, W=Wf, out_dtype=act_dtype)
        cur_h, cur_w = Hf, Wf

    # out_lay: Cout padded 15 -> 16 (lane/MXU friendliness), sliced after.
    w_out = jnp.pad(params["out_lay_w"], ((0, 0), (0, 0), (0, 1)))
    b_out = jnp.pad(params["out_lay_b"], (0, 1))
    h = conv3x3_gn_relu([h], cur_h, cur_w, w_out, b_out,
                        do_gn=False, do_relu=False, out_dtype=jnp.float32)
    return h.reshape(B, 16, cur_h, cur_w)[:, :15]


if __name__ == "__main__":
    B = 2
    nheads, nq = 4, 2
    hidden = 24
    dim = hidden + nheads * nq          # 32 (divisible by 8)
    context_dim = 128                   # inter dims: 64, 32, 16, 8
    fpn_dims = (16, 12, 8)
    H = W = 8                           # fpn spatial: 16, 32, 64
    fpn_batch = 1                       # exercises the _expand index_map path

    key = jax.random.PRNGKey(0)
    k_params, kx, kb, k0, k1, k2 = jax.random.split(key, 6)
    params = init_params(k_params, dim, fpn_dims, context_dim)

    x = jax.random.normal(kx, (B, hidden, H, W), jnp.float32)
    bbox_mask = jax.random.normal(kb, (B, nq, nheads, H, W), jnp.float32)
    fpns = [
        jax.random.normal(k0, (fpn_batch, fpn_dims[0], 2 * H, 2 * W), jnp.float32),
        jax.random.normal(k1, (fpn_batch, fpn_dims[1], 4 * H, 4 * W), jnp.float32),
        jax.random.normal(k2, (fpn_batch, fpn_dims[2], 8 * H, 8 * W), jnp.float32),
    ]

    out = detr_mask_head_small_conv2(x, bbox_mask, fpns, params)
    out = jax.block_until_ready(out)
    assert out.shape == (B, 15, 8 * H, 8 * W), out.shape
    assert out.dtype == jnp.float32
    assert bool(jnp.all(jnp.isfinite(out)))
    print("KERNEL_OK")
</pallas_src>

<mosaic_0001>
module attributes {stable_mosaic.version = 11 : i64} {
  func.func @kernel(%arg0: i32, %arg1: memref<1x24x64xbf16, #tpu.memory_space<vmem>>, %arg2: memref<1x8x64xbf16, #tpu.memory_space<vmem>>, %arg3: memref<32x288xbf16, #tpu.memory_space<vmem>>, %arg4: memref<32x1xf32, #tpu.memory_space<vmem>>, %arg5: memref<32x1xf32, #tpu.memory_space<vmem>>, %arg6: memref<32x1xf32, #tpu.memory_space<vmem>>, %arg7: memref<1x64xbf16, #tpu.memory_space<vmem>>, %arg8: memref<1x64xbf16, #tpu.memory_space<vmem>>, %arg9: memref<1x32x64xbf16, #tpu.memory_space<vmem>>) attributes {dimension_semantics = [#tpu.dimension_semantics<parallel>], iteration_bounds = array<i64: 2>, scalar_prefetch = 0 : i64, scratch_operands = 0 : i64, tpu.core_type = #tpu.core_type<tc>, window_params = [{transform_indices = @transform_0, window_bounds = array<i64: 1, 24, 64>}, {transform_indices = @transform_1, window_bounds = array<i64: 1, 8, 64>}, {pipeline_mode = #tpu.pipeline_mode<synchronous>, transform_indices = @transform_2, window_bounds = array<i64: 32, 288>}, {pipeline_mode = #tpu.pipeline_mode<synchronous>, transform_indices = @transform_3, window_bounds = array<i64: 32, 1>}, {pipeline_mode = #tpu.pipeline_mode<synchronous>, transform_indices = @transform_4, window_bounds = array<i64: 32, 1>}, {pipeline_mode = #tpu.pipeline_mode<synchronous>, transform_indices = @transform_5, window_bounds = array<i64: 32, 1>}, {pipeline_mode = #tpu.pipeline_mode<synchronous>, transform_indices = @transform_6, window_bounds = array<i64: 1, 64>}, {pipeline_mode = #tpu.pipeline_mode<synchronous>, transform_indices = @transform_7, window_bounds = array<i64: 1, 64>}, {transform_indices = @transform_8, window_bounds = array<i64: 1, 32, 64>}]} {
    %c0 = arith.constant 0 : index
    %c0_0 = arith.constant 0 : index
    %c0_1 = arith.constant 0 : index
    %0 = vector.load %arg1[%c0, %c0_0, %c0_1] : memref<1x24x64xbf16, #tpu.memory_space<vmem>>, vector<1x24x64xbf16>
    %1 = vector.shape_cast %0 : vector<1x24x64xbf16> to vector<24x64xbf16>
    %c0_2 = arith.constant 0 : index
    %c0_3 = arith.constant 0 : index
    %c0_4 = arith.constant 0 : index
    %2 = vector.load %arg2[%c0_2, %c0_3, %c0_4] : memref<1x8x64xbf16, #tpu.memory_space<vmem>>, vector<1x8x64xbf16>
    %3 = vector.shape_cast %2 : vector<1x8x64xbf16> to vector<8x64xbf16>
    %4 = tpu.concatenate %1, %3 in 0 : vector<24x64xbf16>, vector<8x64xbf16> -> vector<32x64xbf16>
    %c0_5 = arith.constant 0 : index
    %c0_6 = arith.constant 0 : index
    %5 = vector.load %arg7[%c0_5, %c0_6] : memref<1x64xbf16, #tpu.memory_space<vmem>>, vector<1x64xbf16>
    %c0_7 = arith.constant 0 : index
    %c0_8 = arith.constant 0 : index
    %6 = vector.load %arg8[%c0_7, %c0_8] : memref<1x64xbf16, #tpu.memory_space<vmem>>, vector<1x64xbf16>
    %cst = arith.constant 0.000000e+00 : bf16
    %7 = vector.broadcast %cst : bf16 to vector<32x9xbf16>
    %8 = tpu.concatenate %7, %4, %7 in 1 : vector<32x9xbf16>, vector<32x64xbf16>, vector<32x9xbf16> -> vector<32x82xbf16>
    %9 = vector.extract_strided_slice %8 {offsets = [0, 0], sizes = [32, 64], strides = [1, 1]} : vector<32x82xbf16> to vector<32x64xbf16>
    %10 = vector.broadcast %5 : vector<1x64xbf16> to vector<32x64xbf16>
    %11 = arith.mulf %9, %10 : vector<32x64xbf16>
    %12 = vector.extract_strided_slice %8 {offsets = [0, 1], sizes = [32, 64], strides = [1, 1]} : vector<32x82xbf16> to vector<32x64xbf16>
    %13 = vector.extract_strided_slice %8 {offsets = [0, 2], sizes = [32, 64], strides = [1, 1]} : vector<32x82xbf16> to vector<32x64xbf16>
    %14 = vector.broadcast %6 : vector<1x64xbf16> to vector<32x64xbf16>
    %15 = arith.mulf %13, %14 : vector<32x64xbf16>
    %16 = vector.extract_strided_slice %8 {offsets = [0, 8], sizes = [32, 64], strides = [1, 1]} : vector<32x82xbf16> to vector<32x64xbf16>
    %17 = vector.broadcast %5 : vector<1x64xbf16> to vector<32x64xbf16>
    %18 = arith.mulf %16, %17 : vector<32x64xbf16>
    %19 = vector.extract_strided_slice %8 {offsets = [0, 9], sizes = [32, 64], strides = [1, 1]} : vector<32x82xbf16> to vector<32x64xbf16>
    %20 = vector.extract_strided_slice %8 {offsets = [0, 10], sizes = [32, 64], strides = [1, 1]} : vector<32x82xbf16> to vector<32x64xbf16>
    %21 = vector.broadcast %6 : vector<1x64xbf16> to vector<32x64xbf16>
    %22 = arith.mulf %20, %21 : vector<32x64xbf16>
    %23 = vector.extract_strided_slice %8 {offsets = [0, 16], sizes = [32, 64], strides = [1, 1]} : vector<32x82xbf16> to vector<32x64xbf16>
    %24 = vector.broadcast %5 : vector<1x64xbf16> to vector<32x64xbf16>
    %25 = arith.mulf %23, %24 : vector<32x64xbf16>
    %26 = vector.extract_strided_slice %8 {offsets = [0, 17], sizes = [32, 64], strides = [1, 1]} : vector<32x82xbf16> to vector<32x64xbf16>
    %27 = vector.extract_strided_slice %8 {offsets = [0, 18], sizes = [32, 64], strides = [1, 1]} : vector<32x82xbf16> to vector<32x64xbf16>
    %28 = vector.broadcast %6 : vector<1x64xbf16> to vector<32x64xbf16>
    %29 = arith.mulf %27, %28 : vector<32x64xbf16>
    %30 = tpu.concatenate %11, %12, %15, %18, %19, %22, %25, %26, %29 in 0 : vector<32x64xbf16>, vector<32x64xbf16>, vector<32x64xbf16>, vector<32x64xbf16>, vector<32x64xbf16>, vector<32x64xbf16>, vector<32x64xbf16>, vector<32x64xbf16>, vector<32x64xbf16> -> vector<288x64xbf16>
    %c0_9 = arith.constant 0 : index
    %c0_10 = arith.constant 0 : index
    %31 = vector.load %arg3[%c0_9, %c0_10] : memref<32x288xbf16, #tpu.memory_space<vmem>>, vector<32x288xbf16>
    %cst_11 = arith.constant dense<0.000000e+00> : vector<32x64xf32>
    %32 = tpu.matmul %31, %30, %cst_11 {dimension_numbers = #tpu.dot_dimension_numbers<[1], [0], [0], [1], [0, 0, 1, 1], [], []>} : vector<32x288xbf16>, vector<288x64xbf16>, vector<32x64xf32> -> vector<32x64xf32>
    %c0_12 = arith.constant 0 : index
    %c0_13 = arith.constant 0 : index
    %33 = vector.load %arg4[%c0_12, %c0_13] : memref<32x1xf32, #tpu.memory_space<vmem>>, vector<32x1xf32>
    %34 = vector.broadcast %33 : vector<32x1xf32> to vector<32x64xf32>
    %35 = arith.addf %32, %34 : vector<32x64xf32>
    %cst_14 = arith.constant dense<0.000000e+00> : vector<32xf32>
    %36 = vector.multi_reduction <add>, %35, %cst_14 [1] : vector<32x64xf32> to vector<32xf32>
    %37 = vector.shape_cast %36 : vector<32xf32> to vector<32x1xf32>
    %38 = arith.mulf %35, %35 : vector<32x64xf32>
    %cst_15 = arith.constant dense<0.000000e+00> : vector<32xf32>
    %39 = vector.multi_reduction <add>, %38, %cst_15 [1] : vector<32x64xf32> to vector<32xf32>
    %40 = vector.shape_cast %39 : vector<32xf32> to vector<32x1xf32>
    %41 = vector.extract_strided_slice %37 {offsets = [0, 0], sizes = [4, 1], strides = [1, 1]} : vector<32x1xf32> to vector<4x1xf32>
    %cst_16 = arith.constant dense<0.000000e+00> : vector<1xf32>
    %42 = vector.multi_reduction <add>, %41, %cst_16 [0] : vector<4x1xf32> to vector<1xf32>
    %43 = vector.shape_cast %42 : vector<1xf32> to vector<1x1xf32>
    %cst_17 = arith.constant 3.906250e-03 : f32
    %44 = vector.broadcast %cst_17 : f32 to vector<1x1xf32>
    %45 = arith.mulf %43, %44 : vector<1x1xf32>
    %46 = vector.extract_strided_slice %40 {offsets = [0, 0], sizes = [4, 1], strides = [1, 1]} : vector<32x1xf32> to vector<4x1xf32>
    %cst_18 = arith.constant dense<0.000000e+00> : vector<1xf32>
    %47 = vector.multi_reduction <add>, %46, %cst_18 [0] : vector<4x1xf32> to vector<1xf32>
    %48 = vector.shape_cast %47 : vector<1xf32> to vector<1x1xf32>
    %cst_19 = arith.constant 3.906250e-03 : f32
    %49 = vector.broadcast %cst_19 : f32 to vector<1x1xf32>
    %50 = arith.mulf %48, %49 : vector<1x1xf32>
    %51 = arith.mulf %45, %45 : vector<1x1xf32>
    %52 = arith.subf %50, %51 : vector<1x1xf32>
    %cst_20 = arith.constant 0.000000e+00 : f32
    %53 = vector.broadcast %cst_20 : f32 to vector<1x1xf32>
    %54 = arith.maximumf %52, %53 : vector<1x1xf32>
    %cst_21 = arith.constant 9.99999974E-6 : f32
    %55 = vector.broadcast %cst_21 : f32 to vector<1x1xf32>
    %56 = arith.addf %54, %55 : vector<1x1xf32>
    %57 = math.rsqrt %56 : vector<1x1xf32>
    %58 = vector.shape_cast %45 : vector<1x1xf32> to vector<1x1xf32>
    %59 = vector.broadcast %58 : vector<1x1xf32> to vector<4x1xf32>
    %60 = vector.shape_cast %57 : vector<1x1xf32> to vector<1x1xf32>
    %61 = vector.broadcast %60 : vector<1x1xf32> to vector<4x1xf32>
    %62 = vector.extract_strided_slice %37 {offsets = [4, 0], sizes = [4, 1], strides = [1, 1]} : vector<32x1xf32> to vector<4x1xf32>
    %cst_22 = arith.constant dense<0.000000e+00> : vector<1xf32>
    %63 = vector.multi_reduction <add>, %62, %cst_22 [0] : vector<4x1xf32> to vector<1xf32>
    %64 = vector.shape_cast %63 : vector<1xf32> to vector<1x1xf32>
    %cst_23 = arith.constant 3.906250e-03 : f32
    %65 = vector.broadcast %cst_23 : f32 to vector<1x1xf32>
    %66 = arith.mulf %64, %65 : vector<1x1xf32>
    %67 = vector.extract_strided_slice %40 {offsets = [4, 0], sizes = [4, 1], strides = [1, 1]} : vector<32x1xf32> to vector<4x1xf32>
    %cst_24 = arith.constant dense<0.000000e+00> : vector<1xf32>
    %68 = vector.multi_reduction <add>, %67, %cst_24 [0] : vector<4x1xf32> to vector<1xf32>
    %69 = vector.shape_cast %68 : vector<1xf32> to vector<1x1xf32>
    %cst_25 = arith.constant 3.906250e-03 : f32
    %70 = vector.broadcast %cst_25 : f32 to vector<1x1xf32>
    %71 = arith.mulf %69, %70 : vector<1x1xf32>
    %72 = arith.mulf %66, %66 : vector<1x1xf32>
    %73 = arith.subf %71, %72 : vector<1x1xf32>
    %cst_26 = arith.constant 0.000000e+00 : f32
    %74 = vector.broadcast %cst_26 : f32 to vector<1x1xf32>
    %75 = arith.maximumf %73, %74 : vector<1x1xf32>
    %cst_27 = arith.constant 9.99999974E-6 : f32
    %76 = vector.broadcast %cst_27 : f32 to vector<1x1xf32>
    %77 = arith.addf %75, %76 : vector<1x1xf32>
    %78 = math.rsqrt %77 : vector<1x1xf32>
    %79 = vector.shape_cast %66 : vector<1x1xf32> to vector<1x1xf32>
    %80 = vector.broadcast %79 : vector<1x1xf32> to vector<4x1xf32>
    %81 = vector.shape_cast %78 : vector<1x1xf32> to vector<1x1xf32>
    %82 = vector.broadcast %81 : vector<1x1xf32> to vector<4x1xf32>
    %83 = vector.extract_strided_slice %37 {offsets = [8, 0], sizes = [4, 1], strides = [1, 1]} : vector<32x1xf32> to vector<4x1xf32>
    %cst_28 = arith.constant dense<0.000000e+00> : vector<1xf32>
    %84 = vector.multi_reduction <add>, %83, %cst_28 [0] : vector<4x1xf32> to vector<1xf32>
    %85 = vector.shape_cast %84 : vector<1xf32> to vector<1x1xf32>
    %cst_29 = arith.constant 3.906250e-03 : f32
    %86 = vector.broadcast %cst_29 : f32 to vector<1x1xf32>
    %87 = arith.mulf %85, %86 : vector<1x1xf32>
    %88 = vector.extract_strided_slice %40 {offsets = [8, 0], sizes = [4, 1], strides = [1, 1]} : vector<32x1xf32> to vector<4x1xf32>
    %cst_30 = arith.constant dense<0.000000e+00> : vector<1xf32>
    %89 = vector.multi_reduction <add>, %88, %cst_30 [0] : vector<4x1xf32> to vector<1xf32>
    %90 = vector.shape_cast %89 : vector<1xf32> to vector<1x1xf32>
    %cst_31 = arith.constant 3.906250e-03 : f32
    %91 = vector.broadcast %cst_31 : f32 to vector<1x1xf32>
    %92 = arith.mulf %90, %91 : vector<1x1xf32>
    %93 = arith.mulf %87, %87 : vector<1x1xf32>
    %94 = arith.subf %92, %93 : vector<1x1xf32>
    %cst_32 = arith.constant 0.000000e+00 : f32
    %95 = vector.broadcast %cst_32 : f32 to vector<1x1xf32>
    %96 = arith.maximumf %94, %95 : vector<1x1xf32>
    %cst_33 = arith.constant 9.99999974E-6 : f32
    %97 = vector.broadcast %cst_33 : f32 to vector<1x1xf32>
    %98 = arith.addf %96, %97 : vector<1x1xf32>
    %99 = math.rsqrt %98 : vector<1x1xf32>
    %100 = vector.shape_cast %87 : vector<1x1xf32> to vector<1x1xf32>
    %101 = vector.broadcast %100 : vector<1x1xf32> to vector<4x1xf32>
    %102 = vector.shape_cast %99 : vector<1x1xf32> to vector<1x1xf32>
    %103 = vector.broadcast %102 : vector<1x1xf32> to vector<4x1xf32>
    %104 = vector.extract_strided_slice %37 {offsets = [12, 0], sizes = [4, 1], strides = [1, 1]} : vector<32x1xf32> to vector<4x1xf32>
    %cst_34 = arith.constant dense<0.000000e+00> : vector<1xf32>
    %105 = vector.multi_reduction <add>, %104, %cst_34 [0] : vector<4x1xf32> to vector<1xf32>
    %106 = vector.shape_cast %105 : vector<1xf32> to vector<1x1xf32>
    %cst_35 = arith.constant 3.906250e-03 : f32
    %107 = vector.broadcast %cst_35 : f32 to vector<1x1xf32>
    %108 = arith.mulf %106, %107 : vector<1x1xf32>
    %109 = vector.extract_strided_slice %40 {offsets = [12, 0], sizes = [4, 1], strides = [1, 1]} : vector<32x1xf32> to vector<4x1xf32>
    %cst_36 = arith.constant dense<0.000000e+00> : vector<1xf32>
    %110 = vector.multi_reduction <add>, %109, %cst_36 [0] : vector<4x1xf32> to vector<1xf32>
    %111 = vector.shape_cast %110 : vector<1xf32> to vector<1x1xf32>
    %cst_37 = arith.constant 3.906250e-03 : f32
    %112 = vector.broadcast %cst_37 : f32 to vector<1x1xf32>
    %113 = arith.mulf %111, %112 : vector<1x1xf32>
    %114 = arith.mulf %108, %108 : vector<1x1xf32>
    %115 = arith.subf %113, %114 : vector<1x1xf32>
    %cst_38 = arith.constant 0.000000e+00 : f32
    %116 = vector.broadcast %cst_38 : f32 to vector<1x1xf32>
    %117 = arith.maximumf %115, %116 : vector<1x1xf32>
    %cst_39 = arith.constant 9.99999974E-6 : f32
    %118 = vector.broadcast %cst_39 : f32 to vector<1x1xf32>
    %119 = arith.addf %117, %118 : vector<1x1xf32>
    %120 = math.rsqrt %119 : vector<1x1xf32>
    %121 = vector.shape_cast %108 : vector<1x1xf32> to vector<1x1xf32>
    %122 = vector.broadcast %121 : vector<1x1xf32> to vector<4x1xf32>
    %123 = vector.shape_cast %120 : vector<1x1xf32> to vector<1x1xf32>
    %124 = vector.broadcast %123 : vector<1x1xf32> to vector<4x1xf32>
    %125 = vector.extract_strided_slice %37 {offsets = [16, 0], sizes = [4, 1], strides = [1, 1]} : vector<32x1xf32> to vector<4x1xf32>
    %cst_40 = arith.constant dense<0.000000e+00> : vector<1xf32>
    %126 = vector.multi_reduction <add>, %125, %cst_40 [0] : vector<4x1xf32> to vector<1xf32>
    %127 = vector.shape_cast %126 : vector<1xf32> to vector<1x1xf32>
    %cst_41 = arith.constant 3.906250e-03 : f32
    %128 = vector.broadcast %cst_41 : f32 to vector<1x1xf32>
    %129 = arith.mulf %127, %128 : vector<1x1xf32>
    %130 = vector.extract_strided_slice %40 {offsets = [16, 0], sizes = [4, 1], strides = [1, 1]} : vector<32x1xf32> to vector<4x1xf32>
    %cst_42 = arith.constant dense<0.000000e+00> : vector<1xf32>
    %131 = vector.multi_reduction <add>, %130, %cst_42 [0] : vector<4x1xf32> to vector<1xf32>
    %132 = vector.shape_cast %131 : vector<1xf32> to vector<1x1xf32>
    %cst_43 = arith.constant 3.906250e-03 : f32
    %133 = vector.broadcast %cst_43 : f32 to vector<1x1xf32>
    %134 = arith.mulf %132, %133 : vector<1x1xf32>
    %135 = arith.mulf %129, %129 : vector<1x1xf32>
    %136 = arith.subf %134, %135 : vector<1x1xf32>
    %cst_44 = arith.constant 0.000000e+00 : f32
    %137 = vector.broadcast %cst_44 : f32 to vector<1x1xf32>
    %138 = arith.maximumf %136, %137 : vector<1x1xf32>
    %cst_45 = arith.constant 9.99999974E-6 : f32
    %139 = vector.broadcast %cst_45 : f32 to vector<1x1xf32>
    %140 = arith.addf %138, %139 : vector<1x1xf32>
    %141 = math.rsqrt %140 : vector<1x1xf32>
    %142 = vector.shape_cast %129 : vector<1x1xf32> to vector<1x1xf32>
    %143 = vector.broadcast %142 : vector<1x1xf32> to vector<4x1xf32>
    %144 = vector.shape_cast %141 : vector<1x1xf32> to vector<1x1xf32>
    %145 = vector.broadcast %144 : vector<1x1xf32> to vector<4x1xf32>
    %146 = vector.extract_strided_slice %37 {offsets = [20, 0], sizes = [4, 1], strides = [1, 1]} : vector<32x1xf32> to vector<4x1xf32>
    %cst_46 = arith.constant dense<0.000000e+00> : vector<1xf32>
    %147 = vector.multi_reduction <add>, %146, %cst_46 [0] : vector<4x1xf32> to vector<1xf32>
    %148 = vector.shape_cast %147 : vector<1xf32> to vector<1x1xf32>
    %cst_47 = arith.constant 3.906250e-03 : f32
    %149 = vector.broadcast %cst_47 : f32 to vector<1x1xf32>
    %150 = arith.mulf %148, %149 : vector<1x1xf32>
    %151 = vector.extract_strided_slice %40 {offsets = [20, 0], sizes = [4, 1], strides = [1, 1]} : vector<32x1xf32> to vector<4x1xf32>
    %cst_48 = arith.constant dense<0.000000e+00> : vector<1xf32>
    %152 = vector.multi_reduction <add>, %151, %cst_48 [0] : vector<4x1xf32> to vector<1xf32>
    %153 = vector.shape_cast %152 : vector<1xf32> to vector<1x1xf32>
    %cst_49 = arith.constant 3.906250e-03 : f32
    %154 = vector.broadcast %cst_49 : f32 to vector<1x1xf32>
    %155 = arith.mulf %153, %154 : vector<1x1xf32>
    %156 = arith.mulf %150, %150 : vector<1x1xf32>
    %157 = arith.subf %155, %156 : vector<1x1xf32>
    %cst_50 = arith.constant 0.000000e+00 : f32
    %158 = vector.broadcast %cst_50 : f32 to vector<1x1xf32>
    %159 = arith.maximumf %157, %158 : vector<1x1xf32>
    %cst_51 = arith.constant 9.99999974E-6 : f32
    %160 = vector.broadcast %cst_51 : f32 to vector<1x1xf32>
    %161 = arith.addf %159, %160 : vector<1x1xf32>
    %162 = math.rsqrt %161 : vector<1x1xf32>
    %163 = vector.shape_cast %150 : vector<1x1xf32> to vector<1x1xf32>
    %164 = vector.broadcast %163 : vector<1x1xf32> to vector<4x1xf32>
    %165 = vector.shape_cast %162 : vector<1x1xf32> to vector<1x1xf32>
    %166 = vector.broadcast %165 : vector<1x1xf32> to vector<4x1xf32>
    %167 = vector.extract_strided_slice %37 {offsets = [24, 0], sizes = [4, 1], strides = [1, 1]} : vector<32x1xf32> to vector<4x1xf32>
    %cst_52 = arith.constant dense<0.000000e+00> : vector<1xf32>
    %168 = vector.multi_reduction <add>, %167, %cst_52 [0] : vector<4x1xf32> to vector<1xf32>
    %169 = vector.shape_cast %168 : vector<1xf32> to vector<1x1xf32>
    %cst_53 = arith.constant 3.906250e-03 : f32
    %170 = vector.broadcast %cst_53 : f32 to vector<1x1xf32>
    %171 = arith.mulf %169, %170 : vector<1x1xf32>
    %172 = vector.extract_strided_slice %40 {offsets = [24, 0], sizes = [4, 1], strides = [1, 1]} : vector<32x1xf32> to vector<4x1xf32>
    %cst_54 = arith.constant dense<0.000000e+00> : vector<1xf32>
    %173 = vector.multi_reduction <add>, %172, %cst_54 [0] : vector<4x1xf32> to vector<1xf32>
    %174 = vector.shape_cast %173 : vector<1xf32> to vector<1x1xf32>
    %cst_55 = arith.constant 3.906250e-03 : f32
    %175 = vector.broadcast %cst_55 : f32 to vector<1x1xf32>
    %176 = arith.mulf %174, %175 : vector<1x1xf32>
    %177 = arith.mulf %171, %171 : vector<1x1xf32>
    %178 = arith.subf %176, %177 : vector<1x1xf32>
    %cst_56 = arith.constant 0.000000e+00 : f32
    %179 = vector.broadcast %cst_56 : f32 to vector<1x1xf32>
    %180 = arith.maximumf %178, %179 : vector<1x1xf32>
    %cst_57 = arith.constant 9.99999974E-6 : f32
    %181 = vector.broadcast %cst_57 : f32 to vector<1x1xf32>
    %182 = arith.addf %180, %181 : vector<1x1xf32>
    %183 = math.rsqrt %182 : vector<1x1xf32>
    %184 = vector.shape_cast %171 : vector<1x1xf32> to vector<1x1xf32>
    %185 = vector.broadcast %184 : vector<1x1xf32> to vector<4x1xf32>
    %186 = vector.shape_cast %183 : vector<1x1xf32> to vector<1x1xf32>
    %187 = vector.broadcast %186 : vector<1x1xf32> to vector<4x1xf32>
    %188 = vector.extract_strided_slice %37 {offsets = [28, 0], sizes = [4, 1], strides = [1, 1]} : vector<32x1xf32> to vector<4x1xf32>
    %cst_58 = arith.constant dense<0.000000e+00> : vector<1xf32>
    %189 = vector.multi_reduction <add>, %188, %cst_58 [0] : vector<4x1xf32> to vector<1xf32>
    %190 = vector.shape_cast %189 : vector<1xf32> to vector<1x1xf32>
    %cst_59 = arith.constant 3.906250e-03 : f32
    %191 = vector.broadcast %cst_59 : f32 to vector<1x1xf32>
    %192 = arith.mulf %190, %191 : vector<1x1xf32>
    %193 = vector.extract_strided_slice %40 {offsets = [28, 0], sizes = [4, 1], strides = [1, 1]} : vector<32x1xf32> to vector<4x1xf32>
    %cst_60 = arith.constant dense<0.000000e+00> : vector<1xf32>
    %194 = vector.multi_reduction <add>, %193, %cst_60 [0] : vector<4x1xf32> to vector<1xf32>
    %195 = vector.shape_cast %194 : vector<1xf32> to vector<1x1xf32>
    %cst_61 = arith.constant 3.906250e-03 : f32
    %196 = vector.broadcast %cst_61 : f32 to vector<1x1xf32>
    %197 = arith.mulf %195, %196 : vector<1x1xf32>
    %198 = arith.mulf %192, %192 : vector<1x1xf32>
    %199 = arith.subf %197, %198 : vector<1x1xf32>
    %cst_62 = arith.constant 0.000000e+00 : f32
    %200 = vector.broadcast %cst_62 : f32 to vector<1x1xf32>
    %201 = arith.maximumf %199, %200 : vector<1x1xf32>
    %cst_63 = arith.constant 9.99999974E-6 : f32
    %202 = vector.broadcast %cst_63 : f32 to vector<1x1xf32>
    %203 = arith.addf %201, %202 : vector<1x1xf32>
    %204 = math.rsqrt %203 : vector<1x1xf32>
    %205 = vector.shape_cast %192 : vector<1x1xf32> to vector<1x1xf32>
    %206 = vector.broadcast %205 : vector<1x1xf32> to vector<4x1xf32>
    %207 = vector.shape_cast %204 : vector<1x1xf32> to vector<1x1xf32>
    %208 = vector.broadcast %207 : vector<1x1xf32> to vector<4x1xf32>
    %209 = tpu.concatenate %59, %80, %101, %122, %143, %164, %185, %206 in 0 : vector<4x1xf32>, vector<4x1xf32>, vector<4x1xf32>, vector<4x1xf32>, vector<4x1xf32>, vector<4x1xf32>, vector<4x1xf32>, vector<4x1xf32> -> vector<32x1xf32>
    %210 = tpu.concatenate %61, %82, %103, %124, %145, %166, %187, %208 in 0 : vector<4x1xf32>, vector<4x1xf32>, vector<4x1xf32>, vector<4x1xf32>, vector<4x1xf32>, vector<4x1xf32>, vector<4x1xf32>, vector<4x1xf32> -> vector<32x1xf32>
    %211 = vector.broadcast %209 : vector<32x1xf32> to vector<32x64xf32>
    %212 = arith.subf %35, %211 : vector<32x64xf32>
    %c0_64 = arith.constant 0 : index
    %c0_65 = arith.constant 0 : index
    %213 = vector.load %arg5[%c0_64, %c0_65] : memref<32x1xf32, #tpu.memory_space<vmem>>, vector<32x1xf32>
    %214 = arith.mulf %210, %213 : vector<32x1xf32>
    %215 = vector.broadcast %214 : vector<32x1xf32> to vector<32x64xf32>
    %216 = arith.mulf %212, %215 : vector<32x64xf32>
    %c0_66 = arith.constant 0 : index
    %c0_67 = arith.constant 0 : index
    %217 = vector.load %arg6[%c0_66, %c0_67] : memref<32x1xf32, #tpu.memory_space<vmem>>, vector<32x1xf32>
    %218 = vector.broadcast %217 : vector<32x1xf32> to vector<32x64xf32>
    %219 = arith.addf %216, %218 : vector<32x64xf32>
    %cst_68 = arith.constant 0.000000e+00 : f32
    %220 = vector.broadcast %cst_68 : f32 to vector<32x64xf32>
    %221 = arith.maximumf %219, %220 : vector<32x64xf32>
    %222 = arith.truncf %221 : vector<32x64xf32> to vector<32x64xbf16>
    %c0_69 = arith.constant 0 : index
    %c0_70 = arith.constant 0 : index
    %c0_71 = arith.constant 0 : index
    %223 = vector.load %arg9[%c0_69, %c0_70, %c0_71] : memref<1x32x64xbf16, #tpu.memory_space<vmem>>, vector<1x32x64xbf16>
    %224 = vector.shape_cast %223 : vector<1x32x64xbf16> to vector<32x64xbf16>
    %225 = vector.shape_cast %222 : vector<32x64xbf16> to vector<1x32x64xbf16>
    tpu.vector_store %arg9[%c0_69, %c0_70, %c0_71], %225 {strides = array<i32>} : memref<1x32x64xbf16, #tpu.memory_space<vmem>>, vector<1x32x64xbf16>,
    return
  }
  func.func @transform_0(%arg0: i32) -> (i32, i32, i32) {
    %c0_i32 = arith.constant 0 : i32
    %c0_i32_0 = arith.constant 0 : i32
    %c0_i32_1 = arith.constant 0 : i32
    return %arg0, %c0_i32, %c0_i32_0 : i32, i32, i32
  }
  func.func @transform_1(%arg0: i32) -> (i32, i32, i32) {
    %c0_i32 = arith.constant 0 : i32
    %c0_i32_0 = arith.constant 0 : i32
    %c0_i32_1 = arith.constant 0 : i32
    return %arg0, %c0_i32, %c0_i32_0 : i32, i32, i32
  }
  func.func @transform_2(%arg0: i32) -> (i32, i32) {
    %c0_i32 = arith.constant 0 : i32
    %c0_i32_0 = arith.constant 0 : i32
    %c0_i32_1 = arith.constant 0 : i32
    return %c0_i32, %c0_i32_0 : i32, i32
  }
  func.func @transform_3(%arg0: i32) -> (i32, i32) {
    %c0_i32 = arith.constant 0 : i32
    %c0_i32_0 = arith.constant 0 : i32
    %c0_i32_1 = arith.constant 0 : i32
    return %c0_i32, %c0_i32_0 : i32, i32
  }
  func.func @transform_4(%arg0: i32) -> (i32, i32) {
    %c0_i32 = arith.constant 0 : i32
    %c0_i32_0 = arith.constant 0 : i32
    %c0_i32_1 = arith.constant 0 : i32
    return %c0_i32, %c0_i32_0 : i32, i32
  }
  func.func @transform_5(%arg0: i32) -> (i32, i32) {
    %c0_i32 = arith.constant 0 : i32
    %c0_i32_0 = arith.constant 0 : i32
    %c0_i32_1 = arith.constant 0 : i32
    return %c0_i32, %c0_i32_0 : i32, i32
  }
  func.func @transform_6(%arg0: i32) -> (i32, i32) {
    %c0_i32 = arith.constant 0 : i32
    %c0_i32_0 = arith.constant 0 : i32
    %c0_i32_1 = arith.constant 0 : i32
    return %c0_i32, %c0_i32_0 : i32, i32
  }
  func.func @transform_7(%arg0: i32) -> (i32, i32) {
    %c0_i32 = arith.constant 0 : i32
    %c0_i32_0 = arith.constant 0 : i32
    %c0_i32_1 = arith.constant 0 : i32
    return %c0_i32, %c0_i32_0 : i32, i32
  }
  func.func @transform_8(%arg0: i32) -> (i32, i32, i32) {
    %c0_i32 = arith.constant 0 : i32
    %c0_i32_0 = arith.constant 0 : i32
    %c0_i32_1 = arith.constant 0 : i32
    return %arg0, %c0_i32, %c0_i32_0 : i32, i32, i32
  }
}

</mosaic_0001>

<bundles_post_ra>
// kernel: tpu_custom_call.1
= control target key start
LH: loop header
LB: loop body
LE: loop exit
PB: predicated region body
PF: predicated region fallthrough
CT: control target
= control target key end

     0   :  { %s2365_s0 = inlined_call_operand.hbm [shape: bf16[2,24,64], index: 0, kind: input, shape index: {}]   ;;  %s2366_s1 = inlined_call_operand.hbm [shape: bf16[2,8,64], index: 1, kind: input, shape index: {}]   ;;  %s2367_s2 = inlined_call_operand.hbm [shape: bf16[32,288], index: 2, kind: input, shape index: {}]   ;;  %s2368_s3 = inlined_call_operand.hbm [shape: f32[32,1], index: 3, kind: input, shape index: {}]   ;;  %s2369_s4 = inlined_call_operand.hbm [shape: f32[32,1], index: 4, kind: input, shape index: {}]   ;;  %s2370_s5 = inlined_call_operand.hbm [shape: f32[32,1], index: 5, kind: input, shape index: {}]   ;;  %s2371_s6 = inlined_call_operand.hbm [shape: bf16[1,64], index: 6, kind: input, shape index: {}]   ;;  %s2372_s7 = inlined_call_operand.hbm [shape: bf16[1,64], index: 7, kind: input, shape index: {}]   ;;  %s2373_s8 = inlined_call_operand.hbm [shape: bf16[2,32,64], index: 8, kind: output, shape index: {}]  }
   0x1   :  { %2378 = sst [smem:[#allocation24_spill]] %s2365_s0 }
   0x2   :  { %2379 = sst [smem:[#allocation25_spill]] %s2367_s2 }
   0x3   :  { %2380 = sst [smem:[#allocation26_spill]] %s2368_s3 }
   0x4   :  { %2381 = sst [smem:[#allocation27_spill]] %s2369_s4 }
   0x5   :  { %2382 = sst [smem:[#allocation28_spill]] %s2370_s5 }
   0x6   :  { %2383 = sst [smem:[#allocation29_spill]] %s2371_s6 }
   0x7   :  { %13 = vsyncpa [#allocation3], 0 }
   0x8   :  { %15 = vsyncpa [#allocation3 + $0x1], 0 }
   0x9   :  { %16 = vsyncpa [#allocation6], 0 }
   0xa   :  { %18 = vsyncpa [#allocation6 + $0x1], 0 }
   0xb   :  { %19 = vsyncpa [#allocation9], 0 }
   0xc   :  { %20 = vsyncpa [#allocation12], 0 }
   0xd   :  { %21 = vsyncpa [#allocation15], 0 }
   0xe   :  { %22 = vsyncpa [#allocation4], 0 }
   0xf   :  { %24 = vsyncpa [#allocation4 + $0x1], 0  ;;  %s1903_s27 = smov 0   ;;  %s1905_s28 = smov 0  }
  0x10   :  { %s1907_s29 = smov 0   ;;  %s1909_s30 = smov 0  }
  0x11 LB: > { %s1826_s9 = smov [#allocation7]   ;;  %s1924_s11 = sadd.s32 4294967295, %s1824_s30   ;;  %s1824_s30 = sphi %s1909_s30, %s2415_s30   ;;  %s1820_s29 = sphi %s1907_s29, %s2414_s29   ;;  %s1816_s28 = sphi %s1905_s28, %s2413_s28   ;;  %s1812_s27 = sphi %s1903_s27, %s2412_s27  }
  0x12   : > { %s251_s10 = sshll.u32 %s1826_s9, 4  ;;  %p1258_p0 = scmp.ge.s32.totalorder %s1824_s30, 1  ;;  %s1929_s10 = int_to_ptr.vmem [resolvable:$true] %s251_s10 }
  0x13   : > { %p2374_p1 = scmp.eq.s32.totalorder %s1924_s11, 0  ;;  %p239_p2 = scmp.lt.s32.totalorder %s1824_s30, 3 }
  0x14   : > { %s1827_s13 = smov [#allocation8]   ;;  %s1828_s16 = smov [#allocation11]  }
  0x15   : > { %p1931_p3 = pnand %p1258_p0, %p239_p2  ;;  %s264_s14 = sshll.u32 %s1827_s13, 4  ;;  %s1944_s14 = int_to_ptr.vmem [resolvable:$true] %s264_s14 }
  0x16   : > { %s1946_s17 = sshll.u32 %s1828_s16, 4  ;;  %s2386_s2 = sld [smem:[#allocation25_spill]]  ;;  %s291_s17 = int_to_ptr.vmem [resolvable:$true] %s1946_s17 }
  0x17   : > { %s2384_s12 = scalar_select %p1931_p3, 1, 0 }
  0x18   : > { %p1376_p5 = pneg %p1931_p3 }
  0x1a   : > { %p1940_p6 = pnand %p1376_p5, %p2374_p1 }
  0x1c   : > { %s1510_s20 = scalar_lea.hbm %s2386_s2, 768  ;;  %p1956_p8 = pneg %p1940_p6 }
  0x1d   : > { %p1511_p7 = scmp.ne.s32.totalorder %s2386_s2, %s1510_s20  ;;  %p1517_p11 = scmp.lt.u32.totalorder %s1510_s20, %s2386_s2 }
  0x1f   : > { %p1513_p9 = pnand %p1956_p8, %p1511_p7 }
  0x21   : > { %p1514_p10 = pneg %p1513_p9 }
  0x23   : > { %p1519_p12 = pnand %p1517_p11, %p1514_p10 }
  0x25   : > { %1522 = shalt.err (!%p1519_p12)
}
  0x26   : > { %s1523_s26 = scalar_lea.vmem %s1929_s10, 768  ;;  %p1531_p5 = scmp.lt.s32.totalorder %s1929_s10, %s1929_s10 }
  0x27   : > { %p1524_p13 = scmp.ne.s32.totalorder %s1929_s10, %s1523_s26  ;;  %p1532_p4 = scmp.lt.s32.totalorder %s1523_s26, %s1523_s26 }
  0x29   : > { %p1526_p0 = pnand %p1524_p13, %p1956_p8  ;;  %p1533_p7 = por %p1532_p4, %p1531_p5 }
  0x2b   : > { %p1527_p2 = pneg %p1526_p0 }
  0x2d   : > { %p1534_p9 = pnand %p1533_p7, %p1527_p2 }
  0x2f   : > { %1537 = shalt.err (!%p1534_p9)
}
  0x30   : > { %s1829_s9 = smov 192   ;;  %s1830_s13 = smov 12  }
  0x31   : > { %1379 = dma.hbm_to_vmem [thread:$0]  (!%p1940_p6), %s2386_s2, 768, %s1929_s10, [#allocation6], %s1829_s9, %s1829_s9, %s1830_s13  }
  0x32   : > { %s2388_s3 = sld [smem:[#allocation26_spill]] }
  0x38   : > { %s1538_s21 = scalar_lea.hbm %s2388_s3, 512 }
  0x39   : > { %p1539_p4 = scmp.ne.s32.totalorder %s2388_s3, %s1538_s21  ;;  %p1545_p12 = scmp.lt.u32.totalorder %s1538_s21, %s2388_s3 }
  0x3b   : > { %p1541_p10 = pnand %p1539_p4, %p1956_p8 }
  0x3d   : > { %p1542_p11 = pneg %p1541_p10 }
  0x3f   : > { %p1547_p13 = pnand %p1545_p12, %p1542_p11 }
  0x41   : > { %1550 = shalt.err (!%p1547_p13)
}
  0x42   : > { %s1551_s10 = scalar_lea.vmem %s1944_s14, 512  ;;  %p1559_p7 = scmp.lt.s32.totalorder %s1944_s14, %s1944_s14 }
  0x43   : > { %p1552_p0 = scmp.ne.s32.totalorder %s1944_s14, %s1551_s10  ;;  %p1560_p9 = scmp.lt.s32.totalorder %s1551_s10, %s1551_s10 }
  0x45   : > { %p1554_p2 = pnand %p1552_p0, %p1956_p8  ;;  %p1561_p4 = por %p1560_p9, %p1559_p7 }
  0x47   : > { %p1555_p5 = pneg %p1554_p2 }
  0x49   : > { %p1562_p10 = pnand %p1561_p4, %p1555_p5 }
  0x4b   : > { %1565 = shalt.err (!%p1562_p10)
}
  0x4c   : > { %s1831_s9 = smov 128   ;;  %s1832_s13 = smov 8  }
  0x4d   : > { %1382 = dma.hbm_to_vmem [thread:$0]  (!%p1940_p6), %s2388_s3, 512, %s1944_s14, [#allocation9], %s1831_s9, %s1831_s9, %s1832_s13  }
  0x4e   : > { %s2389_s5 = sld [smem:[#allocation28_spill]] }
  0x54   : > { %s1566_s21 = scalar_lea.hbm %s2389_s5, 512 }
  0x55   : > { %p1567_p11 = scmp.ne.s32.totalorder %s2389_s5, %s1566_s21  ;;  %p1573_p0 = scmp.lt.u32.totalorder %s1566_s21, %s2389_s5 }
  0x57   : > { %p1569_p12 = pnand %p1567_p11, %p1956_p8 }
  0x59   : > { %p1570_p13 = pneg %p1569_p12 }
  0x5b   : > { %p1575_p2 = pnand %p1573_p0, %p1570_p13 }
  0x5d   : > { %1578 = shalt.err (!%p1575_p2)
}
  0x5e   : > { %s1579_s10 = scalar_lea.vmem %s291_s17, 512  ;;  %p1587_p4 = scmp.lt.s32.totalorder %s291_s17, %s291_s17 }
  0x5f   : > { %p1580_p5 = scmp.ne.s32.totalorder %s291_s17, %s1579_s10  ;;  %p1588_p10 = scmp.lt.s32.totalorder %s1579_s10, %s1579_s10 }
  0x61   : > { %p1582_p7 = pnand %p1580_p5, %p1956_p8  ;;  %p1589_p1 = por %p1588_p10, %p1587_p4 }
  0x63   : > { %p1583_p9 = pneg %p1582_p7 }
  0x65   : > { %p1590_p3 = pnand %p1589_p1, %p1583_p9 }
  0x67   : > { %1593 = shalt.err (!%p1590_p3)
}
  0x68   : > { %1388 = dma.hbm_to_vmem [thread:$0]  (!%p1940_p6), %s2389_s5, 512, %s291_s17, [#allocation12], %s1831_s9, %s1831_s9, %s1832_s13  }
  0x69   : > { %s1833_s18 = smov [#allocation10]   ;;  %s1834_s20 = smov [#allocation13]  }
  0x6a   : > { %s277_s19 = sshll.u32 %s1833_s18, 4  ;;  %s304_s21 = sshll.u32 %s1834_s20, 4  ;;  %s278_s19 = int_to_ptr.vmem [resolvable:$true] %s277_s19  ;;  %s305_s21 = int_to_ptr.vmem [resolvable:$true] %s304_s21 }
  0x6b   : > { %s2390_s4 = sld [smem:[#allocation27_spill]] }
  0x71   : > { %s1594_s25 = scalar_lea.hbm %s2390_s4, 512 }
  0x72   : > { %p1595_p1 = scmp.ne.s32.totalorder %s2390_s4, %s1594_s25  ;;  %p1601_p12 = scmp.lt.u32.totalorder %s1594_s25, %s2390_s4 }
  0x74   : > { %p1597_p3 = pnand %p1595_p1, %p1956_p8 }
  0x76   : > { %p1598_p11 = pneg %p1597_p3 }
  0x78   : > { %p1603_p13 = pnand %p1601_p12, %p1598_p11 }
  0x7a   : > { %1606 = shalt.err (!%p1603_p13)
}
  0x7b   : > { %s1607_s17 = scalar_lea.vmem %s278_s19, 512  ;;  %p1615_p7 = scmp.lt.s32.totalorder %s278_s19, %s278_s19 }
  0x7c   : > { %p1608_p0 = scmp.ne.s32.totalorder %s278_s19, %s1607_s17  ;;  %p1616_p9 = scmp.lt.s32.totalorder %s1607_s17, %s1607_s17 }
  0x7e   : > { %p1610_p2 = pnand %p1608_p0, %p1956_p8  ;;  %p1617_p4 = por %p1616_p9, %p1615_p7 }
  0x80   : > { %p1611_p5 = pneg %p1610_p2 }
  0x82   : > { %p1618_p10 = pnand %p1617_p4, %p1611_p5 }
  0x84   : > { %1621 = shalt.err (!%p1618_p10)
}
  0x85   : > { %1385 = dma.hbm_to_vmem [thread:$0]  (!%p1940_p6), %s2390_s4, 512, %s278_s19, [#allocation9], %s1831_s9, %s1831_s9, %s1832_s13  }
  0x86   : > { %s2391_s6 = sld [smem:[#allocation29_spill]] }
  0x8c   : > { %s1622_s22 = scalar_lea.hbm %s2391_s6, 16 }
  0x8d   : > { %p1623_p1 = scmp.ne.s32.totalorder %s2391_s6, %s1622_s22  ;;  %p1629_p12 = scmp.lt.u32.totalorder %s1622_s22, %s2391_s6 }
  0x8f   : > { %p1625_p3 = pnand %p1623_p1, %p1956_p8 }
  0x91   : > { %p1626_p11 = pneg %p1625_p3 }
  0x93   : > { %p1631_p13 = pnand %p1629_p12, %p1626_p11 }
  0x95   : > { %1634 = shalt.err (!%p1631_p13)
}
  0x96   : > { %s1635_s14 = scalar_lea.vmem %s305_s21, 16  ;;  %s1642_s9 = scalar_lea.vmem %s305_s21, 32 }
  0x97   : > { %p1636_p0 = scmp.ne.s32.totalorder %s305_s21, %s1635_s14  ;;  %p1643_p7 = scmp.lt.s32.totalorder %s305_s21, %s305_s21 }
  0x98   : > { %p1644_p9 = scmp.lt.s32.totalorder %s1642_s9, %s1635_s14 }
  0x99   : > { %p1638_p2 = pnand %p1636_p0, %p1956_p8 }
  0x9a   : > { %p1645_p4 = por %p1644_p9, %p1643_p7 }
  0x9b   : > { %p1639_p5 = pneg %p1638_p2 }
  0x9d   : > { %p1646_p10 = pnand %p1645_p4, %p1639_p5 }
  0x9f   : > { %1649 = shalt.err (!%p1646_p10)
}
  0xa0   : > { %1391 = dma.hbm_to_vmem [thread:$0]  (!%p1940_p6), %s2391_s6, 16, %s305_s21, [#allocation12]  }
  0xa1   : > { %s1835_s17 = smov [#allocation14]   ;;  %s1650_s20 = scalar_lea.hbm %s2372_s7, 16 }
  0xa2   : > { %s315_s2 = sshll.u32 %s1835_s17, 4  ;;  %p1651_p1 = scmp.ne.s32.totalorder %s2372_s7, %s1650_s20  ;;  %s316_s2 = int_to_ptr.vmem [resolvable:$true] %s315_s2 }
  0xa3   : > { %p1657_p12 = scmp.lt.u32.totalorder %s1650_s20, %s2372_s7 }
  0xa4   : > { %p1653_p3 = pnand %p1651_p1, %p1956_p8 }
  0xa6   : > { %p1654_p11 = pneg %p1653_p3 }
  0xa8   : > { %p1659_p13 = pnand %p1657_p12, %p1654_p11 }
  0xaa   : > { %1662 = shalt.err (!%p1659_p13)
}
  0xab   : > { %s1663_s21 = scalar_lea.vmem %s316_s2, 16  ;;  %s1670_s10 = scalar_lea.vmem %s316_s2, 32 }
  0xac   : > { %p1664_p0 = scmp.ne.s32.totalorder %s316_s2, %s1663_s21  ;;  %p1671_p7 = scmp.lt.s32.totalorder %s316_s2, %s316_s2 }
  0xad   : > { %p1672_p9 = scmp.lt.s32.totalorder %s1670_s10, %s1663_s21 }
  0xae   : > { %p1666_p2 = pnand %p1664_p0, %p1956_p8 }
  0xaf   : > { %p1673_p4 = por %p1672_p9, %p1671_p7 }
  0xb0   : > { %p1667_p5 = pneg %p1666_p2 }
  0xb2   : > { %p1674_p10 = pnand %p1673_p4, %p1667_p5 }
  0xb4   : > { %1677 = shalt.err (!%p1674_p10)
}
  0xb5   : > { %1394 = dma.hbm_to_vmem [thread:$0]  (!%p1940_p6), %s2372_s7, 16, %s316_s2, [#allocation15]  }
  0xb6   : > { %s1257_s23 = sadd.s32 4294967294, %s1824_s30   ;;  %s2084_s15 = sadd.s32 1, %s1824_s30  }
  0xb7   : > { %s34_s13 = ssub.s32 %s1824_s30, %s2084_s15  ;;  %s37_s19 = sadd.s32 1, %s1820_s29 }
  0xb8   : > { %p35_p8 = scmp.eq.s32.totalorder %s34_s13, 0  ;;  %p44_p1 = scmp.ne.s32.totalorder %s1820_s29, %s1816_s28 }
  0xb9   : > { %p45_p3 = scmp.eq.s32.totalorder %s1824_s30, 0  ;;  %p50_p11 = scmp.ne.s32.totalorder %s1816_s28, %s1812_s27 }
  0xba   : > { %s2095_s17 = scalar_select %p35_p8, %s1820_s29, %s37_s19  }
  0xbb   : > { %p46_p12 = por %p45_p3, %p44_p1  ;;  %p2392_p13 = scmp.eq.s32.totalorder %s1924_s11, 0 }
  0xbc   : > { %p226_p6 = scmp.eq.s32.totalorder %s1924_s11, 1  ;;  %p232_p2 = scmp.eq.s32.totalorder %s1257_s23, 1 }
  0xbd   : > { %p2099_p0 = por %p2392_p13, %p50_p11  ;;  %p1412_p5 = scmp.lt.s32.totalorder %s1824_s30, 2 }
  0xbe   : > { %s2106_s2 = sand.u32 1, %s1820_s29   ;;  %p2108_p7 = por %p226_p6, %p44_p1 }
  0xbf   : > { %s2393_s16 = scalar_select %p2099_p0, 1, 0 }
  0xc0   : > { %s2394_s18 = scalar_select %p2108_p7, 1, 0 }
  0xc1   : > { %p2112_p9 = por %p232_p2, %p50_p11  ;;  %s1343_s22 = smul.u32 12, %s2106_s2 }
  0xc2   : > { %s1344_s24 = smul.u32 192, %s1824_s30  ;;  %p2118_p4 = pnand %p1412_p5, %p46_p12 }
  0xc3   : > { %s2395_s20 = scalar_select %p2112_p9, 1, 0 }
  0xc4   : > { %s2397_s0 = sld [smem:[#allocation24_spill]]  ;;  %s330_s14 = scalar_lea.vmem [#allocation2], %s1343_s22 }
  0xc5   : > { %s337_s9 = sshll.u32 %s330_s14, 4  ;;  %s327_s13 = scalar_lea.sflag [#allocation3], %s2106_s2  ;;  %s2127_s9 = int_to_ptr.vmem [resolvable:$true] %s337_s9 }
  0xc6   : > { %p1680_p8 = pneg %p2118_p4 }
  0xca   : > { %s2125_s10 = scalar_lea.hbm %s2397_s0, %s1344_s24  ;;  %s1683_s21 = scalar_lea.hbm %s2397_s0, 384 }
  0xcb   : > { %s1678_s19 = scalar_lea.hbm %s2125_s10, 192  ;;  %p1684_p11 = scmp.lt.u32.totalorder %s2125_s10, %s2397_s0 }
  0xcc   : > { %p1679_p10 = scmp.ne.s32.totalorder %s2125_s10, %s1678_s19  ;;  %p1685_p12 = scmp.lt.u32.totalorder %s1683_s21, %s1678_s19 }
  0xcd   : > { %p1687_p6 = scmp.lt.u32.totalorder %s1678_s19, %s2125_s10 }
  0xce   : > { %p1681_p1 = pnand %p1680_p8, %p1679_p10  ;;  %p1686_p13 = por %p1685_p12, %p1684_p11 }
  0xd0   : > { %p1682_p3 = pneg %p1681_p1  ;;  %p1688_p2 = por %p1687_p6, %p1686_p13 }
  0xd2   : > { %p1689_p5 = pnand %p1688_p2, %p1682_p3 }
  0xd4   : > { %1692 = shalt.err (!%p1689_p5)
}
  0xd5   : > { %s1693_s22 = scalar_lea.vmem %s2127_s9, 192  ;;  %s1836_s14 = smov [#allocation2]  }
  0xd6   : > { %p1694_p10 = scmp.ne.s32.totalorder %s2127_s9, %s1693_s22  ;;  %s1698_s24 = sshll.u32 %s1836_s14, 4  ;;  %s1699_s24 = int_to_ptr.vmem [resolvable:$false] %s1698_s24 }
  0xd7   : > { %s1700_s3 = scalar_lea.vmem %s1699_s24, 384  ;;  %p1701_p7 = scmp.lt.s32.totalorder %s2127_s9, %s1699_s24 }
  0xd8   : > { %p1696_p1 = pnand %p1694_p10, %p1680_p8  ;;  %p1702_p11 = scmp.lt.s32.totalorder %s1700_s3, %s1693_s22 }
  0xda   : > { %p1697_p9 = pneg %p1696_p1  ;;  %p1703_p12 = por %p1702_p11, %p1701_p7 }
  0xdc   : > { %p1704_p13 = pnand %p1703_p12, %p1697_p9 }
  0xde   : > { %1707 = shalt.err (!%p1704_p13)
}
  0xdf   : > { %s1837_s4 = smov 64   ;;  %s1838_s19 = smov 4  }
  0xe0   : > { %1398 = dma.hbm_to_vmem [thread:$0]  (!%p2118_p4), %s2125_s10, 192, %s2127_s9, %s327_s13, %s1837_s4, %s1837_s4, %s1838_s19  }
  0xe1   : > { %s1267_s26 = sshll.u32 %s2106_s2, 2  ;;  %s1268_s21 = sshll.u32 %s1824_s30, 6 }
  0xe2   : > { %s2163_s24 = scalar_lea.hbm %s2366_s1, %s1268_s21  ;;  %s351_s3 = scalar_lea.vmem [#allocation5], %s1267_s26 }
  0xe3   : > { %s358_s23 = sshll.u32 %s351_s3, 4  ;;  %s2398_s0 = sand.u32 1, %s1824_s30   ;;  %s359_s23 = int_to_ptr.vmem [resolvable:$true] %s358_s23 }
  0xe4   : > { %s348_s5 = scalar_lea.sflag [#allocation6], %s2398_s0  ;;  %s1708_s6 = scalar_lea.hbm %s2163_s24, 64 }
  0xe5   : > { %p1709_p7 = scmp.ne.s32.totalorder %s2163_s24, %s1708_s6  ;;  %s1713_s9 = scalar_lea.hbm %s2366_s1, 128 }
  0xe6   : > { %p1714_p6 = scmp.lt.u32.totalorder %s2163_s24, %s2366_s1  ;;  %p1715_p2 = scmp.lt.u32.totalorder %s1713_s9, %s1708_s6 }
  0xe7   : > { %p1711_p9 = pnand %p1709_p7, %p1680_p8  ;;  %p1717_p10 = scmp.lt.u32.totalorder %s1708_s6, %s2163_s24 }
  0xe8   : > { %p1716_p5 = por %p1715_p2, %p1714_p6 }
  0xe9   : > { %p1712_p3 = pneg %p1711_p9 }
  0xea   : > { %p1718_p1 = por %p1717_p10, %p1716_p5 }
  0xec   : > { %p1719_p11 = pnand %p1718_p1, %p1712_p3 }
  0xee   : > { %1722 = shalt.err (!%p1719_p11)
}
  0xef   : > { %s1723_s0 = scalar_lea.vmem %s359_s23, 64  ;;  %s1839_s19 = smov [#allocation5]  }
  0xf0   : > { %p1724_p12 = scmp.ne.s32.totalorder %s359_s23, %s1723_s0  ;;  %s1728_s26 = sshll.u32 %s1839_s19, 4  ;;  %s1729_s26 = int_to_ptr.vmem [resolvable:$false] %s1728_s26 }
  0xf1   : > { %s1730_s21 = scalar_lea.vmem %s1729_s26, 128  ;;  %p1731_p9 = scmp.lt.s32.totalorder %s359_s23, %s1729_s26 }
  0xf2   : > { %p1726_p13 = pnand %p1724_p12, %p1680_p8  ;;  %p1732_p0 = scmp.lt.s32.totalorder %s1730_s21, %s1723_s0 }
  0xf4   : > { %p1727_p7 = pneg %p1726_p13  ;;  %p1733_p2 = por %p1732_p0, %p1731_p9 }
  0xf6   : > { %p1734_p6 = pnand %p1733_p2, %p1727_p7 }
  0xf8   : > { %1737 = shalt.err (!%p1734_p6)
}
  0xf9   : > { %1401 = dma.hbm_to_vmem [thread:$0]  (!%p2118_p4), %s2163_s24, 64, %s359_s23, %s348_s5  }
  0xfa   : > { %p2399_p3 = scmp.ne.s32.totalorder %s2384_s12, 0 }
  0xfb   : > { %s2189_s6 = sand.u32 (!%p2399_p3), 1, %s1816_s28   ;;  %p2400_p8 = scmp.ne.s32.totalorder (!%p2399_p3), %s2393_s16, 0 }
  0xfc   : > { %367 = sbr.rel (%p2399_p3) target bundleno = 1126 (0x466), region = 52  ;;  %s370_s22 = scalar_lea.sflag (!%p2399_p3), [#allocation3], %s2189_s6 }
  0xfd   : > { %s1345_s14 = smul.u32 (!%p2399_p3), 12, %s2189_s6 }
  0xff   : > { %s373_s3 = scalar_lea.vmem (!%p2399_p3), [#allocation2], %s1345_s14 }
 0x103   : > { %1783 = dma.done.wait (%p2400_p8), %s370_s22, 192  }
 0x104   : > { %1785 = vsyncadd (%p2400_p8), %s370_s22, 4294967104  ;;  %s378_s5 = sand.u32 1, %s1924_s11   ;;  %s1270_s12 = sshll.u32 %s2189_s6, 2 }
 0x105   : > { %s379_s25 = scalar_lea.sflag [#allocation6], %s378_s5  ;;  %s382_s23 = scalar_lea.vmem [#allocation5], %s1270_s12 }
 0x106   : > { %1787 = dma.done.wait (%p2400_p8), %s379_s25, 64  }
 0x107   : > { %1789 = vsyncadd (%p2400_p8), %s379_s25, 4294967232  ;;  %p2401_p0 = scmp.eq.s32.totalorder %s1924_s11, 0 }
 0x109   : > { %1791 = dma.done.wait (%p2401_p0), [#allocation6], 768   ;;  %p2402_p4 = pmov %p2401_p0 }
 0x10a   : > { %p2403_p5 = pmov %p2401_p0 }
 0x10b   : > { %1793 = vsyncadd (%p2402_p4), [#allocation6], 4294966528 }
 0x10c   : > { %1795 = dma.done.wait (%p2403_p5), [#allocation9], 1024   ;;  %p2404_p10 = pmov %p2401_p0 }
 0x10d   : > { %p2405_p1 = pmov %p2401_p0 }
 0x10e   : > { %1797 = vsyncadd (%p2404_p10), [#allocation9], 4294966272 }
 0x10f   : > { %1799 = dma.done.wait (%p2405_p1), [#allocation12], 528   ;;  %p2406_p11 = pmov %p2401_p0 }
 0x110   : > { %p2407_p12 = pmov %p2401_p0 }
 0x111   : > { %1801 = vsyncadd (%p2406_p11), [#allocation12], 4294966768 }
 0x112   : > { %1803 = dma.done.wait (%p2407_p12), [#allocation15], 16   ;;  %p2408_p13 = pmov %p2401_p0 }
 0x113   : > { %v485_v0 = vlaneseq  ;;  %vm460_vm0 = vcmask 1043456   ;;  %v1483_v2 = vld [vmem:[%s373_s3] sm:$0xff]   ;;  %s1840_s16 = smov 9   ;;  %v1484_v6 = vld [vmem:[%s373_s3 + $0x8] ss:$0 sps:$4 sm:$0xff]   ;;  %s1841_s24 = smov 10  }
 0x114   : > { %1805 = vsyncadd (%p2408_p13), [#allocation15], 4294967280  ;;  %v465_v4 = vld [vmem:[#allocation14] sm:$0x1]  ;;  %467 = vrot.lane.b32.xlu0 %v1483_v2, %s1840_s16  ;;  %v1485_v7 = vld [vmem:[%s382_s23] ss:$0 sps:$4 sm:$0xff]  }
 0x115   : > { %v486_v1 = vshrl.u32 %v485_v0, 7  ;;  %v492_v5 = vpack.i.b16 %v465_v4, %v465_v4  ;;  %v464_v8 = vld [vmem:[#allocation13] sm:$0x1]  ;;  %v463_v11 = vsel %vm460_vm0, %v1484_v6, %v1485_v7  ;;  %s1842_s2 = smov 16   ;;  %s1843_s10 = smov 2   ;;  %vm471_vm1 = vcmask 72704  }
 0x116   : > { %v483_v9 = vpack.i.b16 %v464_v8, %v464_v8  ;;  %s1844_s9 = smov 8   ;;  %s1845_s13 = smov 18   ;;  %vm477_vm2 = vcmask 596992   ;;  %v1488_v27 = vld [vmem:[#allocation7 + $0x4] ss:$12 sps:$4 sm:$0xff]   ;;  %vm647_vm3 = vcmask 261120  }
 0x117   : > { %v487_v3 = vsub.s32 0, %v486_v1  ;;  %s1846_s4 = smov 119   ;;  %s1847_s0 = smov 118   ;;  %686 = vmatprep.mubr.bf16.mxu0 %v1488_v27  ;;  %v1489_v30 = vld [vmem:[#allocation7 + $0x8] ss:$12 sps:$4 sm:$0xff]   ;;  %v1854_v35 = vmov 0  }
 0x118   : > { %469 = vrot.lane.b32.xlu0 %v463_v11, %s1840_s16  ;;  %s1848_s19 = smov 127   ;;  %s1849_s26 = smov 112   ;;  %1339 = vmatprep.mubr.msk.bf16.mxu1 %vm647_vm3, %v1489_v30  ;;  %v593_v36 = vld [vmem:[#allocation8] sm:$0xff]  ;;  %v595_v38 = vld [vmem:[#allocation8 + $0x10] sm:$0xff]  ;;  %v594_v39 = vld [vmem:[#allocation8 + $0x8] sm:$0xff]  ;;  %vm752_vm4 = vcmask 523264  }
 0x119   : > { %v497_v10 = vrot.slane %v492_v5, %v487_v3  ;;  %v2220_v12 = vrot.slane %v483_v9, %v487_v3  ;;  %s1850_s21 = smov 126   ;;  %s1851_s14 = smov 111   ;;  %1481 = vset.pattern.permute.xlu1 %v1854_v35  ;;  %1482 = vset.pattern.permute.xlu0 %v1854_v35  ;;  %v596_v40 = vld [vmem:[#allocation8 + $0x18] sm:$0xff]  ;;  %v1493_v62 = vld [vmem:[#allocation7 + $0x18] ss:$12 sps:$4 sm:$0xff]   ;;  %vm1085_vm5 = vcmask 519168  }
 0x11a   : > { %s1852_s22 = smov 120   ;;  %s1853_s3 = smov 110   ;;  %v1486_v58 = vld [vmem:[#allocation7] ss:$12 sps:$4 sm:$0xff]   ;;  %v1491_v59 = vld [vmem:[#allocation7 + $0x1c] ss:$12 sps:$4 sm:$0xff]  }
 0x11b   : > { %510 = vrot.lane.b32.xlu1 %v497_v10, %s1841_s24  ;;  %v1490_v61 = vld [vmem:[#allocation7 + $0x20] ss:$12 sps:$4 sm:$0xff]   ;;  %s1277_s5 = sshll.u32 %s2189_s6, 4  ;;  %s1302_s23 = sshll.u32 %s1924_s11, 8 }
 0x11c   : > { %499 = vrot.lane.b32.xlu0 %v497_v10, %s1843_s10  ;;  %s443_s12 = scalar_lea.vmem [#allocation16], %s1277_s5  ;;  %s1091_s10 = scalar_lea.sflag [#allocation4], %s2189_s6 }
 0x11d   : > { %s1104_s25 = sshll.u32 %s443_s12, 4  ;;  %p2409_p9 = scmp.ne.s32.totalorder %s2394_s18, 0  ;;  %s2315_s25 = int_to_ptr.vmem [resolvable:$true] %s1104_s25 }
 0x11e   : > { %s1855_s11 = smov [#allocation16]  }
 0x11f   : > { %515 = vrot.lane.b32.xlu1 %v2220_v12, %s1842_s2  ;;  %s2320_s2 = scalar_lea.hbm %s2373_s8, %s1302_s23 }
 0x120   : > { %520 = vrot.lane.b32.xlu0 %v497_v10, %s1845_s13  ;;  %s1742_s13 = sshll.u32 %s1855_s11, 4  ;;  %s1743_s13 = int_to_ptr.vmem [resolvable:$false] %s1742_s13 }
 0x121   : > { %p1745_p3 = scmp.lt.s32.totalorder %s2315_s25, %s1743_s13 }
 0x123   : > { %505 = vrot.lane.b32.xlu1 %v2220_v12, %s1844_s9  ;;  %s1738_s9 = scalar_lea.vmem %s2315_s25, 256 }
 0x124   : > { %p1739_p7 = scmp.ne.s32.totalorder %s2315_s25, %s1738_s9 }
 0x126   : > { %p1740_p2 = pnand %p1739_p7, %p2409_p9 }
 0x128   : > { %p1741_p6 = pneg %p1740_p2 }
 0x186   : > { %v468_v13 = vpop.permute.xlu0 %467 }
 0x187   : > { %v474_v14 = vsel %vm471_vm1, 0, %v468_v13 }
 0x188   : > { %v478_v15 = vsel %vm477_vm2, %v474_v14, 0 }
 0x189   : > { %549 = vrot.lane.b32.xlu1 %v478_v15, %s1846_s4  ;;  %v489_v42 = vmul.bf16 %v2220_v12, %v478_v15 }
 0x18a   : > { %v470_v17 = vpop.permute.xlu0 %469 }
 0x18b   : > { %v476_v19 = vsel %vm471_vm1, 0, %v470_v17 }
 0x18c   : > { %v480_v20 = vsel %vm477_vm2, %v476_v19, 0 }
 0x18d   : > { %v511_v16 = vpop.permute.xlu1 %510  ;;  %551 = vrot.lane.b32.xlu0 %v480_v20, %s1846_s4  ;;  %v490_v45 = vmul.bf16 %v2220_v12, %v480_v20  ;;  %s1744_s4 = scalar_lea.vmem %s1743_s13, 512 }
 0x18e   : > { %v513_v18 = vmul.bf16 %v511_v16, %v478_v15  ;;  %v514_v21 = vmul.bf16 %v511_v16, %v480_v20  ;;  %v500_v24 = vpop.permute.xlu0 %499  ;;  %p1746_p8 = scmp.lt.s32.totalorder %s1744_s4, %s1738_s9 }
 0x18f   : > { %v502_v26 = vmul.bf16 %v500_v24, %v478_v15  ;;  %v503_v28 = vmul.bf16 %v500_v24, %v480_v20 }
 0x190   : > { %557 = vrot.lane.b32.xlu1 %v513_v18, %s1847_s0  ;;  %p1747_p0 = por %p1746_p8, %p1745_p3 }
 0x191   : > { %v516_v22 = vpop.permute.xlu1 %515  ;;  %527 = vrot.lane.b32.xlu0 %v478_v15, %s1848_s19 }
 0x192   : > { %v518_v23 = vmul.bf16 %v516_v22, %v478_v15  ;;  %v519_v25 = vmul.bf16 %v516_v22, %v480_v20  ;;  %v521_v32 = vpop.permute.xlu0 %520  ;;  %p1748_p4 = pnand %p1747_p0, %p1741_p6 }
 0x193   : > { %v523_v34 = vmul.bf16 %v521_v32, %v478_v15  ;;  %v524_v37 = vmul.bf16 %v521_v32, %v480_v20 }
 0x194   : > { %559 = vrot.lane.b32.xlu1 %v514_v21, %s1847_s0 }
 0x195   : > { %529 = vrot.lane.b32.xlu0 %v480_v20, %s1848_s19  ;;  %v506_v29 = vpop.permute.xlu1 %505 }
 0x196   : > { %v508_v31 = vmul.bf16 %v506_v29, %v478_v15  ;;  %v509_v33 = vmul.bf16 %v506_v29, %v480_v20 }
 0x198   : > { %565 = vrot.lane.b32.xlu1 %v518_v23, %s1849_s26 }
 0x199   : > { %535 = vrot.lane.b32.xlu0 %v502_v26, %s1850_s21 }
 0x19c   : > { %567 = vrot.lane.b32.xlu1 %v519_v25, %s1849_s26 }
 0x19d   : > { %537 = vrot.lane.b32.xlu0 %v503_v28, %s1850_s21 }
 0x1a0   : > { %571 = vrot.lane.b32.xlu1 %v478_v15, %s1851_s14 }
 0x1a1   : > { %543 = vrot.lane.b32.xlu0 %v508_v31, %s1852_s22 }
 0x1a4   : > { %573 = vrot.lane.b32.xlu1 %v480_v20, %s1851_s14 }
 0x1a5   : > { %545 = vrot.lane.b32.xlu0 %v509_v33, %s1852_s22 }
 0x1a8   : > { %579 = vrot.lane.b32.xlu1 %v523_v34, %s1853_s3 }
 0x1a9   : > { %581 = vrot.lane.b32.xlu0 %v524_v37, %s1853_s3 }
 0x1ac   : > { %599 = vperm.xlu1 %1481, %v593_v36  }
 0x1ad   : > { %604 = vperm.xlu0 %1482, %v594_v39   ;;  %v1038_v39 = vld [vmem:[#allocation11 + $0x8] sm:$0xff] }
 0x1b0   : > { %609 = vperm.xlu1 %1481, %v595_v38  }
 0x1b4   : > { %614 = vperm.xlu1 %1481, %v596_v40   ;;  %v1037_v40 = vld [vmem:[#allocation11] sm:$0xff] }
 0x1fb   : > { %v550_v41 = vpop.permute.xlu1 %549 }
 0x1fc   : > { %1303 = vmatprep.subr.bf16.mxu0 %v550_v41 }
 0x1fd   : > { %1304 = vmatpush3.bf16.msra.mxu0 %v489_v42 }
 0x1ff   : > { %v552_v44 = vpop.permute.xlu0 %551 }
 0x200   : > { %1305 = vmatprep.subr.bf16.mxu0 %v552_v44 }
 0x201   : > { %1306 = vmatpush3.bf16.msra.mxu0 %v490_v45 }
 0x202   : > { %v558_v43 = vpop.permute.xlu1 %557 }
 0x203   : > { %1307 = vmatprep.subr.bf16.mxu0 %v558_v43  ;;  %v528_v47 = vpop.permute.xlu0 %527 }
 0x205   : > { %1308 = vmatpush3.bf16.msra.mxu0 %v528_v47 }
 0x206   : > { %v560_v46 = vpop.permute.xlu1 %559 }
 0x207   : > { %1309 = vmatprep.subr.bf16.mxu0 %v560_v46  ;;  %v530_v49 = vpop.permute.xlu0 %529 }
 0x209   : > { %1310 = vmatpush3.bf16.msra.mxu0 %v530_v49 }
 0x20a   : > { %v566_v48 = vpop.permute.xlu1 %565 }
 0x20b   : > { %1311 = vmatprep.subr.bf16.mxu0 %v566_v48  ;;  %v536_v51 = vpop.permute.xlu0 %535 }
 0x20d   : > { %1312 = vmatpush3.bf16.msra.mxu0 %v536_v51 }
 0x20e   : > { %v568_v50 = vpop.permute.xlu1 %567 }
 0x20f   : > { %1313 = vmatprep.subr.bf16.mxu0 %v568_v50  ;;  %v538_v53 = vpop.permute.xlu0 %537 }
 0x211   : > { %1314 = vmatpush3.bf16.msra.mxu0 %v538_v53 }
 0x212   : > { %v572_v52 = vpop.permute.xlu1 %571 }
 0x213   : > { %1315 = vmatprep.subr.bf16.mxu0 %v572_v52  ;;  %v544_v55 = vpop.permute.xlu0 %543 }
 0x215   : > { %1316 = vmatpush3.bf16.msra.mxu0 %v544_v55 }
 0x216   : > { %v574_v54 = vpop.permute.xlu1 %573 }
 0x217   : > { %1317 = vmatprep.subr.bf16.mxu0 %v574_v54  ;;  %v546_v57 = vpop.permute.xlu0 %545 }
 0x219   : > { %1318 = vmatpush3.bf16.msra.mxu0 %v546_v57 }
 0x21a   : > { %v580_v56 = vpop.permute.xlu1 %579 }
 0x21b   : > { %1335 = vmatprep.subr.bf16.mxu1 %v580_v56  ;;  %v582_v60 = vpop.permute.xlu0 %581 }
 0x21c   : > { %1336 = vmatpush3.bf16.msra.mxu1 %v580_v56  ;;  %687 = vmatmul.mubr.bf16.vlgmr.msra.gmra.mrb[0].mxu0 %v1486_v58 }
 0x21d   : > { %1337 = vmatprep.subr.bf16.mxu1 %v582_v60  ;;  %694 = vmatprep.mubr.bf16.mxu0 %v1491_v59 }
 0x220   : > { %1338 = vmatpush3.bf16.msra.mxu1 %v582_v60 }
 0x223   : > { %1340 = vmatmul.mubr.msk.bf16.vlgmr.msra.gmra.mrb[0].mxu1 %vm647_vm3, %v1490_v61 }
 0x224   : > { %695 = vmatmul.mubr.bf16.gmra.mrb[4].mxu0 %v1493_v62 }
 0x22b   : > { %v600_v0 = vpop.permute.xlu1 %599 }
 0x22c   : > { %v605_v5 = vpop.permute.xlu0 %604 }
 0x22f   : > { %v610_v13 = vpop.permute.xlu1 %609 }
 0x233   : > { %v615_v28 = vpop.permute.xlu1 %614 }
 0x2ef   : > { %v1319_v63 = vpop.f32.mrb[0].mxu0 }
 0x2f0   : > { %v1320_v1 = vpop.f32.mrb[1].mxu0 }
 0x2f1   : > { %v1321_v2 = vadd.f32 %v1320_v1, %v1319_v63  ;;  %v1322_v3 = vpop.f32.mrb[2].mxu0 }
 0x2f2   : > { %v1323_v4 = vpop.f32.mrb[3].mxu0 }
 0x2f3   : > { %v1324_v6 = vadd.f32 %v1323_v4, %v1322_v3  ;;  %v689_v8 = vadd.f32 %v1321_v2, %v600_v0 }
 0x2f5   : > { %v692_v11 = vadd.f32 %v1324_v6, %v605_v5 }
 0x2f6   : > { %v1341_v7 = vpop.f32.mrb[0].mxu1 }
 0x2f7   : > { %v737_v9 = vpop.f32.mrb[1].mxu1  ;;  %v1325_v16 = vpop.f32.mrb[4].mxu0 }
 0x2f8   : > { %v2228_v10 = vadd.f32 %v737_v9, %v689_v8  ;;  %v1342_v12 = vpop.f32.mrb[2].mxu1  ;;  %v1326_v18 = vpop.f32.mrb[5].mxu0 }
 0x2f9   : > { %v740_v14 = vpop.f32.mrb[3].mxu1  ;;  %v1327_v19 = vadd.f32 %v1326_v18, %v1325_v16  ;;  %v1328_v20 = vpop.f32.mrb[6].mxu0 }
 0x2fa   : > { %v2230_v15 = vadd.f32 %v740_v14, %v692_v11  ;;  %v753_v17 = vsel %vm752_vm4, %v2228_v10, 0.0  ;;  %v765_v23 = vmul.f32 %v2228_v10, %v2228_v10  ;;  %v1329_v24 = vpop.f32.mrb[7].mxu0 }
 0x2fb   : > { %754 = vadd.xlane.f32.xlu0 %v753_v17  ;;  %v697_v25 = vadd.f32 %v1327_v19, %v610_v13  ;;  %v1330_v26 = vadd.f32 %v1329_v24, %v1328_v20 }
 0x2fc   : > { %v756_v21 = vsel %vm752_vm4, %v2230_v15, 0.0  ;;  %v766_v22 = vmul.f32 %v2230_v15, %v2230_v15  ;;  %v769_v31 = vsel %vm752_vm4, %v765_v23, 0.0 }
 0x2fd   : > { %757 = vadd.xlane.f32.xlu1 %v756_v21  ;;  %v2241_v29 = vadd.f32 %v1341_v7, %v697_v25  ;;  %v700_v30 = vadd.f32 %v1330_v26, %v615_v28 }
 0x2fe   : > { %v772_v27 = vsel %vm752_vm4, %v766_v22, 0.0 }
 0x2ff   : > { %773 = vadd.xlane.f32.xlu0 %v772_v27  ;;  %v2244_v32 = vadd.f32 %v1342_v12, %v700_v30  ;;  %v759_v33 = vsel %vm752_vm4, %v2241_v29, 0.0  ;;  %v767_v34 = vmul.f32 %v2241_v29, %v2241_v29 }
 0x301   : > { %770 = vadd.xlane.f32.xlu1 %v769_v31  ;;  %v775_v35 = vsel %vm752_vm4, %v767_v34, 0.0  ;;  %v762_v36 = vsel %vm752_vm4, %v2244_v32, 0.0  ;;  %v768_v37 = vmul.f32 %v2244_v32, %v2244_v32 }
 0x303   : > { %760 = vadd.xlane.f32.xlu0 %v759_v33  ;;  %v778_v38 = vsel %vm752_vm4, %v768_v37, 0.0 }
 0x305   : > { %776 = vadd.xlane.f32.xlu1 %v775_v35 }
 0x307   : > { %763 = vadd.xlane.f32.xlu0 %v762_v36 }
 0x30b   : > { %779 = vadd.xlane.f32.xlu0 %v778_v38 }
 0x316   : > { %1048 = vperm.xlu1 %1481, %v1038_v39  }
 0x321   : > { %1043 = vperm.xlu0 %1482, %v1037_v40  }
 0x388   : > { %v755_v41 = vpop.xlane.xlu0 %754 }
 0x389   : > { %v781_v42 = vsel %vm460_vm0, %v755_v41, 0.0  ;;  %v803_v43 = vrot.slane %v755_v41, 4 }
 0x38a   : > { %v782_v44 = vrot.slane %v781_v42, 4  ;;  %v758_v45 = vpop.xlane.xlu1 %757 }
 0x38b   : > { %v805_v46 = vsel %vm460_vm0, %v803_v43, 0.0  ;;  %v829_v47 = vsel %vm460_vm0, %v758_v45, 0.0  ;;  %v851_v48 = vrot.slane %v758_v45, 4 }
 0x38c   : > { %v783_v49 = vadd.f32 %v782_v44, %v781_v42  ;;  %v806_v50 = vrot.slane %v805_v46, 4  ;;  %v830_v51 = vrot.slane %v829_v47, 4  ;;  %v774_v52 = vpop.xlane.xlu0 %773 }
 0x38d   : > { %v853_v53 = vsel %vm460_vm0, %v851_v48, 0.0  ;;  %v837_v54 = vsel %vm460_vm0, %v774_v52, 0.0  ;;  %v862_v55 = vrot.slane %v774_v52, 4 }
 0x38e   : > { %v784_v56 = vrot.slane %v783_v49, 2  ;;  %v807_v57 = vadd.f32 %v806_v50, %v805_v46  ;;  %v831_v58 = vadd.f32 %v830_v51, %v829_v47  ;;  %v854_v59 = vrot.slane %v853_v53, 4  ;;  %v771_v60 = vpop.xlane.xlu1 %770 }
 0x38f   : > { %v838_v61 = vrot.slane %v837_v54, 4  ;;  %v864_v62 = vsel %vm460_vm0, %v862_v55, 0.0  ;;  %v789_v63 = vsel %vm460_vm0, %v771_v60, 0.0  ;;  %v814_v0 = vrot.slane %v771_v60, 4 }
 0x390   : > { %v2263_v1 = vadd.f32 %v784_v56, %v783_v49  ;;  %v808_v2 = vrot.slane %v807_v57, 2  ;;  %v832_v3 = vrot.slane %v831_v58, 2  ;;  %v855_v4 = vadd.f32 %v854_v59, %v853_v53  ;;  %v761_v5 = vpop.xlane.xlu0 %760 }
 0x391   : > { %v839_v6 = vadd.f32 %v838_v61, %v837_v54  ;;  %v865_v7 = vrot.slane %v864_v62, 4  ;;  %v790_v8 = vrot.slane %v789_v63, 4  ;;  %v816_v9 = vsel %vm460_vm0, %v814_v0, 0.0 }
 0x392   : > { %v786_v11 = vrot.slane %v2263_v1, 1  ;;  %v2267_v12 = vadd.f32 %v808_v2, %v807_v57  ;;  %v2269_v13 = vadd.f32 %v832_v3, %v831_v58  ;;  %v817_v18 = vrot.slane %v816_v9, 4  ;;  %v777_v19 = vpop.xlane.xlu1 %776 }
 0x393   : > { %v840_v14 = vrot.slane %v839_v6, 2  ;;  %v866_v16 = vadd.f32 %v865_v7, %v864_v62  ;;  %v791_v17 = vadd.f32 %v790_v8, %v789_v63  ;;  %v856_v21 = vrot.slane %v855_v4, 2 }
 0x394   : > { %v834_v20 = vrot.slane %v2269_v13, 1  ;;  %v877_v22 = vsel %vm460_vm0, %v761_v5, 0.0  ;;  %v899_v23 = vrot.slane %v761_v5, 4  ;;  %v818_v27 = vadd.f32 %v817_v18, %v816_v9  ;;  %v764_v34 = vpop.xlane.xlu0 %763 }
 0x395   : > { %v841_v24 = vadd.f32 %v840_v14, %v839_v6  ;;  %v867_v25 = vrot.slane %v866_v16, 2  ;;  %v792_v26 = vrot.slane %v791_v17, 2  ;;  %v878_v28 = vrot.slane %v877_v22, 4 }
 0x396   : > { %v901_v30 = vsel %vm460_vm0, %v899_v23, 0.0  ;;  %v885_v31 = vsel %vm460_vm0, %v777_v19, 0.0  ;;  %v910_v33 = vrot.slane %v777_v19, 4  ;;  %v819_v38 = vrot.slane %v818_v27, 2 }
 0x397   : > { %v842_v35 = vrot.slane %v841_v24, 1  ;;  %v868_v36 = vadd.f32 %v867_v25, %v866_v16  ;;  %v793_v37 = vadd.f32 %v792_v26, %v791_v17  ;;  %v879_v39 = vadd.f32 %v878_v28, %v877_v22 }
 0x398   : > { %v902_v40 = vrot.slane %v901_v30, 4  ;;  %v886_v41 = vrot.slane %v885_v31, 4  ;;  %v912_v42 = vsel %vm460_vm0, %v910_v33, 0.0  ;;  %v820_v46 = vadd.f32 %v819_v38, %v818_v27  ;;  %v780_v59 = vpop.xlane.xlu0 %779 }
 0x399   : > { %v843_v43 = vadd.f32 %v842_v35, %v841_v24  ;;  %v869_v44 = vrot.slane %v868_v36, 1  ;;  %v794_v45 = vrot.slane %v793_v37, 1  ;;  %v880_v47 = vrot.slane %v879_v39, 2 }
 0x39a   : > { %v903_v48 = vadd.f32 %v902_v40, %v901_v30  ;;  %v887_v49 = vadd.f32 %v886_v41, %v885_v31  ;;  %v913_v50 = vrot.slane %v912_v42, 4  ;;  %v2276_v51 = vadd.f32 %v856_v21, %v855_v4 }
 0x39b   : > { %v870_v52 = vadd.f32 %v869_v44, %v868_v36  ;;  %v795_v53 = vadd.f32 %v794_v45, %v793_v37  ;;  %v821_v54 = vrot.slane %v820_v46, 1  ;;  %v881_v55 = vadd.f32 %v880_v47, %v879_v39 }
 0x39c   : > { %v904_v56 = vrot.slane %v903_v48, 2  ;;  %v888_v57 = vrot.slane %v887_v49, 2  ;;  %v914_v58 = vadd.f32 %v913_v50, %v912_v42  ;;  %v2278_v60 = vmul.f32 0.00390625, %v843_v43 }
 0x39d   : > { %v2280_v61 = vmul.f32 0.00390625, %v870_v52  ;;  %v796_v62 = vmul.f32 0.00390625, %v795_v53  ;;  %v925_v63 = vsel %vm460_vm0, %v764_v34, 0.0  ;;  %v822_v0 = vadd.f32 %v821_v54, %v820_v46 }
 0x39e   : > { %v882_v2 = vrot.slane %v881_v55, 1  ;;  %v889_v3 = vadd.f32 %v888_v57, %v887_v49  ;;  %v915_v4 = vrot.slane %v914_v58, 2  ;;  %v905_v5 = vadd.f32 %v904_v56, %v903_v48 }
 0x39f   : > { %v926_v6 = vrot.slane %v925_v63, 4  ;;  %v947_v7 = vrot.slane %v764_v34, 4  ;;  %v933_v8 = vsel %vm460_vm0, %v780_v59, 0.0  ;;  %v958_v17 = vrot.slane %v780_v59, 4 }
 0x3a0   : > { %v890_v9 = vrot.slane %v889_v3, 1  ;;  %v916_v14 = vadd.f32 %v915_v4, %v914_v58  ;;  %v934_v16 = vrot.slane %v933_v8, 4  ;;  %v787_v21 = vadd.f32 %v786_v11, %v2263_v1 }
 0x3a1   : > { %v927_v18 = vadd.f32 %v926_v6, %v925_v63  ;;  %v949_v19 = vsel %vm460_vm0, %v947_v7, 0.0  ;;  %v810_v22 = vrot.slane %v2267_v12, 1  ;;  %v960_v28 = vsel %vm460_vm0, %v958_v17, 0.0 }
 0x3a2   : > { %v891_v23 = vadd.f32 %v890_v9, %v889_v3  ;;  %v917_v24 = vrot.slane %v916_v14, 1  ;;  %v950_v25 = vrot.slane %v949_v19, 4  ;;  %v935_v26 = vadd.f32 %v934_v16, %v933_v8 }
 0x3a3   : > { %v928_v27 = vrot.slane %v927_v18, 2  ;;  %v788_v30 = vmul.f32 0.00390625, %v787_v21  ;;  %v811_v31 = vadd.f32 %v810_v22, %v2267_v12  ;;  %v823_v33 = vmul.f32 0.00390625, %v822_v0 }
 0x3a4   : > { %v918_v34 = vadd.f32 %v917_v24, %v916_v14  ;;  %v951_v35 = vadd.f32 %v950_v25, %v949_v19  ;;  %v936_v36 = vrot.slane %v935_v26, 2  ;;  %v892_v37 = vmul.f32 0.00390625, %v891_v23 }
 0x3a5   : > { %v929_v38 = vadd.f32 %v928_v27, %v927_v18  ;;  %v961_v39 = vrot.slane %v960_v28, 4  ;;  %v812_v1 = vmul.f32 0.00390625, %v811_v31  ;;  %v797_v41 = vmul.f32 %v788_v30, %v788_v30 }
 0x3a6   : > { %v919_v11 = vmul.f32 0.00390625, %v918_v34  ;;  %v937_v40 = vadd.f32 %v936_v36, %v935_v26  ;;  %v835_v42 = vadd.f32 %v834_v20, %v2269_v13  ;;  %v952_v43 = vrot.slane %v951_v35, 2 }
 0x3a7   : > { %v962_v44 = vadd.f32 %v961_v39, %v960_v28  ;;  %v824_v45 = vmul.f32 %v812_v1, %v812_v1  ;;  %v973_v12 = vsel %vm460_vm0, %v788_v30, %v812_v1  ;;  %v930_v46 = vrot.slane %v929_v38, 1 }
 0x3a8   : > { %v938_v47 = vrot.slane %v937_v40, 1  ;;  %983 = vperm.xlu1 %1481, %v973_v12   ;;  %v798_v48 = vsub.f32 %v796_v62, %v797_v41  ;;  %v836_v49 = vmul.f32 0.00390625, %v835_v42  ;;  %v858_v53 = vrot.slane %v2276_v51, 1 }
 0x3a9   : > { %v963_v50 = vrot.slane %v962_v44, 2  ;;  %v825_v52 = vsub.f32 %v823_v33, %v824_v45  ;;  %v883_v54 = vadd.f32 %v882_v2, %v881_v55  ;;  %v906_v59 = vrot.slane %v905_v5, 1 }
 0x3aa   : > { %v939_v56 = vadd.f32 %v938_v47, %v937_v40  ;;  %v799_v57 = vmax.f32 %v798_v48, 0.0  ;;  %v845_v58 = vmul.f32 %v836_v49, %v836_v49  ;;  %v859_v63 = vadd.f32 %v858_v53, %v2276_v51  ;;  %v1007_v53 = vld [vmem:[#allocation10 + $0x10] sm:$0xff] }
 0x3ab   : > { %v964_v13 = vadd.f32 %v963_v50, %v962_v44  ;;  %v826_v20 = vmax.f32 %v825_v52, 0.0  ;;  %v884_v0 = vmul.f32 0.00390625, %v883_v54  ;;  %v953_v3 = vadd.f32 %v952_v43, %v951_v35  ;;  %v1006_v50 = vld [vmem:[#allocation10 + $0x8] sm:$0xff] }
 0x3ac   : > { %v800_v4 = vadd.f32 1e-05, %v799_v57  ;;  %v846_v6 = vsub.f32 %v2278_v60, %v845_v58  ;;  %v907_v62 = vadd.f32 %v906_v59, %v905_v5  ;;  %v860_v9 = vmul.f32 0.00390625, %v859_v63  ;;  %v1008_v63 = vld [vmem:[#allocation10 + $0x18] sm:$0xff] }
 0x3ad   : > { %v965_v7 = vrot.slane %v964_v13, 1  ;;  %v827_v8 = vadd.f32 1e-05, %v826_v20  ;;  %v893_v14 = vmul.f32 %v884_v0, %v884_v0  ;;  %v931_v16 = vadd.f32 %v930_v46, %v929_v38 }
 0x3ae   : > { %1494 = vrsqrt.f32 %v800_v4  ;;  %v847_v55 = vmax.f32 %v846_v6, 0.0  ;;  %v908_v2 = vmul.f32 0.00390625, %v907_v62  ;;  %v940_v17 = vmul.f32 0.00390625, %v939_v56  ;;  %v1040_v6 = vld [vmem:[#allocation11 + $0x18] sm:$0xff]  ;;  %v1049_v62 = vpop.permute.xlu1 %1048 }
 0x3af   : > { %1496 = vrsqrt.f32 %v827_v8  ;;  %v872_v18 = vmul.f32 %v860_v9, %v860_v9  ;;  %v974_v19 = vsel %vm460_vm0, %v836_v49, %v860_v9  ;;  %v966_v51 = vadd.f32 %v965_v7, %v964_v13  ;;  %v1039_v13 = vld [vmem:[#allocation11 + $0x10] sm:$0xff]  ;;  %v1044_v7 = vpop.permute.xlu0 %1043 }
 0x3b0   : > { %988 = vperm.xlu0 %1482, %v974_v19   ;;  %v920_v21 = vmul.f32 %v908_v2, %v908_v2  ;;  %v975_v22 = vsel %vm460_vm0, %v884_v0, %v908_v2  ;;  %v894_v60 = vsub.f32 %v892_v37, %v893_v14  ;;  %v848_v5 = vadd.f32 1e-05, %v847_v55 }
 0x3b1   : > { %v873_v23 = vsub.f32 %v2280_v61, %v872_v18  ;;  %993 = vperm.xlu1 %1481, %v975_v22   ;;  %v932_v24 = vmul.f32 0.00390625, %v931_v16  ;;  %v954_v25 = vrot.slane %v953_v3, 1  ;;  %v967_v33 = vmul.f32 0.00390625, %v966_v51 }
 0x3b2   : > { %v921_v26 = vsub.f32 %v919_v11, %v920_v21  ;;  %v895_v27 = vmax.f32 %v894_v60, 0.0  ;;  %1498 = vrsqrt.f32 %v848_v5  ;;  %v1005_v11 = vld [vmem:[#allocation10] sm:$0xff] }
 0x3b3   : > { %v874_v28 = vmax.f32 %v873_v23, 0.0  ;;  %v955_v30 = vadd.f32 %v954_v25, %v953_v3  ;;  %v941_v31 = vmul.f32 %v932_v24, %v932_v24 }
 0x3b4   : > { %v922_v34 = vmax.f32 %v921_v26, 0.0  ;;  %v896_v35 = vadd.f32 1e-05, %v895_v27 }
 0x3b5   : > { %v875_v36 = vadd.f32 1e-05, %v874_v28  ;;  %v956_v38 = vmul.f32 0.00390625, %v955_v30  ;;  %v942_v39 = vsub.f32 %v940_v17, %v941_v31 }
 0x3b6   : > { %v923_v1 = vadd.f32 1e-05, %v922_v34  ;;  %1500 = vrsqrt.f32 %v896_v35 }
 0x3b7   : > { %1502 = vrsqrt.f32 %v875_v36  ;;  %v968_v37 = vmul.f32 %v956_v38, %v956_v38  ;;  %v976_v61 = vsel %vm460_vm0, %v932_v24, %v956_v38  ;;  %v943_v40 = vmax.f32 %v942_v39, 0.0 }
 0x3b8   : > { %v1495_v41 = vpop.eup %1494  ;;  %1504 = vrsqrt.f32 %v923_v1  ;;  %998 = vperm.xlu1 %1481, %v976_v61  }
 0x3b9   : > { %v1497_v42 = vpop.eup %1496  ;;  %v969_v43 = vsub.f32 %v967_v33, %v968_v37  ;;  %v944_v44 = vadd.f32 1e-05, %v943_v40 }
 0x3ba   : > { %v977_v45 = vsel %vm460_vm0, %v1495_v41, %v1497_v42 }
 0x3bb   : > { %v970_v12 = vmax.f32 %v969_v43, 0.0  ;;  %v1009_v46 = vmul.f32 %v1005_v11, %v977_v45  ;;  %1506 = vrsqrt.f32 %v944_v44 }
 0x3bc   : > { %v1499_v48 = vpop.eup %1498 }
 0x3bd   : > { %v971_v47 = vadd.f32 1e-05, %v970_v12  ;;  %1015 = vperm.xlu0 %1482, %v1009_v46  }
 0x3bf   : > { %1508 = vrsqrt.f32 %v971_v47 }
 0x3c0   : > { %v1501_v49 = vpop.eup %1500 }
 0x3c1   : > { %v1503_v52 = vpop.eup %1502 }
 0x3c2   : > { %v1505_v54 = vpop.eup %1504  ;;  %v978_v56 = vsel %vm460_vm0, %v1499_v48, %v1503_v52 }
 0x3c3   : > { %v1010_v57 = vmul.f32 %v1006_v50, %v978_v56  ;;  %v979_v58 = vsel %vm460_vm0, %v1501_v49, %v1505_v54 }
 0x3c4   : > { %v1011_v59 = vmul.f32 %v1007_v53, %v979_v58 }
 0x3c5   : > { %1020 = vperm.xlu1 %1481, %v1010_v57   ;;  %v1507_v20 = vpop.eup %1506 }
 0x3c6   : > { %1025 = vperm.xlu0 %1482, %v1011_v59  }
 0x3c9   : > { %v1509_v0 = vpop.eup %1508 }
 0x3ca   : > { %1053 = vperm.xlu0 %1482, %v1039_v13   ;;  %v980_v3 = vsel %vm460_vm0, %v1507_v20, %v1509_v0 }
 0x3cb   : > { %v1012_v4 = vmul.f32 %v1008_v63, %v980_v3 }
 0x3cd   : > { %1030 = vperm.xlu1 %1481, %v1012_v4  }
 0x3d1   : > { %1058 = vperm.xlu1 %1481, %v1040_v6  }
 0x427   : > { %v984_v8 = vpop.permute.xlu1 %983 }
 0x428   : > { %v1001_v55 = vsub.f32 %v2228_v10, %v984_v8 }
 0x42f   : > { %v989_v9 = vpop.permute.xlu0 %988 }
 0x430   : > { %v994_v14 = vpop.permute.xlu1 %993  ;;  %v1002_v51 = vsub.f32 %v2230_v15, %v989_v9 }
 0x431   : > { %v1003_v23 = vsub.f32 %v2241_v29, %v994_v14 }
 0x437   : > { %v999_v18 = vpop.permute.xlu1 %998 }
 0x438   : > { %v1004_v31 = vsub.f32 %v2244_v32, %v999_v18 }
 0x43c   : > { %v1016_v2 = vpop.permute.xlu0 %1015 }
 0x43d   : > { %v1033_v16 = vmul.f32 %v1016_v2, %v1001_v55 }
 0x43f   : > { %v1061_v17 = vadd.f32 %v1044_v7, %v1033_v16 }
 0x441   : > { %v1065_v19 = vmax.f32 %v1061_v17, 0.0 }
 0x443   : > { %v1298_v21 = vpack.c.bf16 %v1065_v19, %v1065_v19 }
 0x444   : > { %v1021_v22 = vpop.permute.xlu1 %1020 }
 0x445   : > { %v1034_v60 = vmul.f32 %v1021_v22, %v1002_v51  ;;  %1086 = vst.msk [vmem:[%s443_s12] sm:$0xf] %vm1085_vm5, %v1298_v21  ;;  %v1026_v5 = vpop.permute.xlu0 %1025 }
 0x446   : > { %v1035_v10 = vmul.f32 %v1026_v5, %v1003_v23 }
 0x447   : > { %v1062_v24 = vadd.f32 %v1049_v62, %v1034_v60 }
 0x449   : > { %v1066_v25 = vmax.f32 %v1062_v24, 0.0  ;;  %v1054_v26 = vpop.permute.xlu0 %1053 }
 0x44a   : > { %v1063_v27 = vadd.f32 %v1054_v26, %v1035_v10 }
 0x44b   : > { %v1299_v28 = vpack.c.bf16 %v1066_v25, %v1066_v25 }
 0x44c   : > { %v1067_v30 = vmax.f32 %v1063_v27, 0.0  ;;  %v1031_v15 = vpop.permute.xlu1 %1030 }
 0x44d   : > { %1087 = vst.msk [vmem:[%s443_s12 + $0x4] sm:$0xf] %vm1085_vm5, %v1299_v28  ;;  %v1036_v34 = vmul.f32 %v1031_v15, %v1004_v31 }
 0x44e   : > { %v1300_v33 = vpack.c.bf16 %v1067_v30, %v1067_v30 }
 0x450   : > { %1088 = vst.msk [vmem:[%s443_s12 + $0x8] sm:$0xf] %vm1085_vm5, %v1300_v33  ;;  %v1059_v29 = vpop.permute.xlu1 %1058 }
 0x451   : > { %v1064_v35 = vadd.f32 %v1059_v29, %v1036_v34 }
 0x453   : > { %v1068_v36 = vmax.f32 %v1064_v35, 0.0 }
 0x455   : > { %v1301_v32 = vpack.c.bf16 %v1068_v36, %v1068_v36 }
 0x457   : > { %1089 = vst.msk [vmem:[%s443_s12 + $0xc] sm:$0xf] %vm1085_vm5, %v1301_v32 }
 0x458   : > { %1751 = shalt.err (!%p1748_p4)
}
 0x459   : > { %s1752_s0 = scalar_lea.hbm %s2320_s2, 256  ;;  %s1756_s21 = scalar_lea.hbm %s2373_s8, 512 }
 0x45a   : > { %p1753_p5 = scmp.ne.s32.totalorder %s2320_s2, %s1752_s0  ;;  %p1757_p11 = scmp.lt.u32.totalorder %s2320_s2, %s2373_s8 }
 0x45b   : > { %p1758_p12 = scmp.lt.u32.totalorder %s1756_s21, %s1752_s0  ;;  %p1760_p7 = scmp.lt.u32.totalorder %s1752_s0, %s2320_s2 }
 0x45c   : > { %p1754_p10 = pnand %p1753_p5, %p2409_p9 }
 0x45d   : > { %p1759_p13 = por %p1758_p12, %p1757_p11 }
 0x45e   : > { %p1755_p1 = pneg %p1754_p10 }
 0x45f   : > { %p1761_p2 = por %p1760_p7, %p1759_p13 }
 0x461   : > { %p1762_p6 = pnand %p1761_p2, %p1755_p1 }
 0x463   : > { %1765 = shalt.err (!%p1762_p6)
}
 0x464   : > { %s1856_s3 = smov 64   ;;  %s1857_s5 = smov 4  }
 0x465   : > { %1374 = dma.vmem_to_hbm [thread:$0]  (%p2409_p9), %s2315_s25, 256, %s2320_s2, %s1091_s10, %s1856_s3, %s1856_s3, %s1857_s5  }
 0x466 PF: > { %s1119_s12 = sand.u32 1, %s1812_s27   ;;  %p2410_p3 = scmp.ne.s32.totalorder %s2395_s20, 0 }
 0x467   : > { %p2411_p8 = scmp.ge.s32.totalorder %s1824_s30, 2  ;;  %s1120_s23 = scalar_lea.sflag [#allocation4], %s1119_s12 }
 0x469   : > { %p1403_p0 = pnand %p2411_p8, %p2410_p3 }
 0x46b   : > { %1807 = dma.done.wait (!%p1403_p0), %s1120_s23, 256  }
 0x46c   : > { %1809 = vsyncadd (!%p1403_p0), %s1120_s23, 4294967040  ;;  %p27_p4 = scmp.ge.s32.totalorder %s2084_s15, 4   ;;  %s2412_s27 = smov %s1816_s28 }
 0x46d   : > { %s2413_s28 = smov %s1820_s29  ;;  %s2414_s29 = smov %s2095_s17 }
 0x46e   : > { %s2415_s30 = smov %s2084_s15  ;;  %29 = sbr.rel (!%p27_p4) target bundleno = 17 (0x11), region = 134 }
 0x475   :  { %1125 = vsyncpa [#allocation3], 1 }
 0x476   :  { %1127 = vsyncpa [#allocation3 + $0x1], 1 }
 0x477   :  { %1128 = vsyncpa [#allocation6], 1 }
 0x478   :  { %1130 = vsyncpa [#allocation6 + $0x1], 1 }
 0x479   :  { %1131 = vsyncpa [#allocation9], 1 }
 0x47a   :  { %1132 = vsyncpa [#allocation12], 1 }
 0x47b   :  { %1133 = vsyncpa [#allocation15], 1 }
 0x47c   :  { %1134 = vsyncpa [#allocation4], 1 }
 0x47d   :  { %1136 = vsyncpa [#allocation4 + $0x1], 1 }

</bundles_post_ra>
